<compile_context>
chip_gen: v5e
topology: v5e:2x2
jax: 0.10.0
libtpu: 0.0.40
codegen_flags: <defaults>
</compile_context>

<pallas_src>
import jax
import jax.numpy as jnp
from jax.experimental import pallas as pl
from jax.experimental.pallas import tpu as pltpu


def embed_gather_kernel(idx_ref, w_hbm, out_ref, buf, sem):
    """Gather one tile of T token embeddings via per-row DMAs.

    idx_ref : (Np,)  int32  all (padded) token ids, scalar-prefetched into SMEM
    w_hbm   : (V, D)        embedding table, left in HBM (memory_space=pl.ANY)
    out_ref : (T, D)        output tile (VMEM, pipelined writeback)
    buf     : (T, D)        VMEM scratch that receives the row DMAs
    sem     : (T,)          DMA semaphores, one per in-flight row copy
    """
    T = out_ref.shape[0]
    V = w_hbm.shape[0]
    base = pl.program_id(0) * T

    # Issue all T row DMAs first (they overlap), then wait for all of them.
    copies = []
    for t in range(T):  # T is static -> fully unrolled
        row = idx_ref[base + t]
        # torch nn.Embedding raises on out-of-range ids; here we clamp to avoid an
        # out-of-bounds HBM DMA.  TODO(synk): no in-kernel error reporting for OOB ids.
        row = jnp.minimum(jnp.maximum(row, 0), V - 1)
        cp = pltpu.make_async_copy(w_hbm.at[row], buf.at[t], sem.at[t])
        cp.start()
        copies.append(cp)
    for cp in copies:
        cp.wait()

    # Single lane-dense (T, D) store into the pipelined output block.
    out_ref[...] = buf[...]


def embedder_forward(idx, weight, *, tile=128):
    """Equivalent of Embedder.forward: returns weight[idx] with shape (B, S, D)."""
    B, S = idx.shape
    V, D = weight.shape
    N = B * S

    # Large tiles amortize the ~0.35 us per-grid-step overhead; keep the tile small
    # (but >= 8 for sublane alignment) when the whole problem is tiny.
    T = int(max(8, min(tile, pl.next_power_of_2(N))))

    idx_flat = idx.reshape(N).astype(jnp.int32)
    pad = (-N) % T
    if pad:
        # Padded ids gather row 0 (a valid row); the tail is sliced off below.
        idx_flat = jnp.pad(idx_flat, (0, pad))
    Np = idx_flat.shape[0]

    out = pl.pallas_call(
        embed_gather_kernel,
        out_shape=jax.ShapeDtypeStruct((Np, D), weight.dtype),
        grid_spec=pltpu.PrefetchScalarGridSpec(
            num_scalar_prefetch=1,                          # idx -> SMEM
            grid=(Np // T,),
            in_specs=[pl.BlockSpec(memory_space=pl.ANY)],   # table stays in HBM
            out_specs=pl.BlockSpec((T, D), lambda i, ids: (i, 0)),
            scratch_shapes=[
                pltpu.VMEM((T, D), weight.dtype),
                pltpu.SemaphoreType.DMA((T,)),
            ],
        ),
        compiler_params=pltpu.CompilerParams(
            dimension_semantics=("parallel",),              # token tiles are independent
        ),
    )(idx_flat, weight)

    return out[:N].reshape(B, S, D)


if __name__ == "__main__":
    # Small, deterministic setup consistent with the module's __init__.
    vocab_size = 32
    embed_dim = 128
    batch, seq = 2, 8

    key = jax.random.PRNGKey(0)
    k_w, k_idx = jax.random.split(key)

    # nn.Embedding(vocab_size, embed_dim, padding_idx=0): row 0 is zeroed.
    weight = jax.random.normal(k_w, (vocab_size, embed_dim), dtype=jnp.float32)
    weight = weight.at[0].set(0.0)

    idx = jax.random.randint(k_idx, (batch, seq), 0, vocab_size, dtype=jnp.int32)

    out = embedder_forward(idx, weight)
    out = jax.block_until_ready(out)

    # Reference check against plain JAX gather (same semantics as torch embedding).
    ref = jnp.take(weight, idx, axis=0)
    assert out.shape == (batch, seq, embed_dim)
    assert jnp.allclose(out, ref, atol=1e-6), "mismatch vs reference gather"

    print("KERNEL_OK")
</pallas_src>

<mosaic_0001>
module attributes {stable_mosaic.version = 11 : i64} {
  func.func @embed_gather_kernel(%arg0: i32, %arg1: memref<16xi32, #tpu.memory_space<smem>>, %arg2: memref<32x128xf32, #tpu.memory_space<any>>, %arg3: memref<16x128xf32, #tpu.memory_space<vmem>>, %arg4: memref<16x128xf32, #tpu.memory_space<vmem>>, %arg5: memref<16x!tpu.dma_semaphore, #tpu.memory_space<semaphore_mem>>) attributes {dimension_semantics = [#tpu.dimension_semantics<parallel>], iteration_bounds = array<i64: 1>, scalar_prefetch = 1 : i64, scratch_operands = 2 : i64, tpu.core_type = #tpu.core_type<tc>, window_params = [{}, {transform_indices = @transform_1, window_bounds = array<i64: 16, 128>}]} {
    %c16_i32 = arith.constant 16 : i32
    %0 = arith.muli %arg0, %c16_i32 : i32
    %c0_i32 = arith.constant 0 : i32
    %1 = arith.addi %0, %c0_i32 : i32
    %2 = arith.index_cast %1 : i32 to index
    %3 = memref.load %arg1[%2] : memref<16xi32, #tpu.memory_space<smem>>
    %c0_i32_0 = arith.constant 0 : i32
    %4 = arith.maxsi %3, %c0_i32_0 : i32
    %c31_i32 = arith.constant 31 : i32
    %5 = arith.minsi %4, %c31_i32 : i32
    %c0_i32_1 = arith.constant 0 : i32
    %c0_i32_2 = arith.constant 0 : i32
    %c0_i32_3 = arith.constant 0 : i32
    %6 = tpu.memref_slice %arg2[%5, %c0_i32_3] : memref<32x128xf32, #tpu.memory_space<any>> -> memref<1x128xf32, #tpu.memory_space<any>>
    %7 = tpu.memref_squeeze %6 : memref<1x128xf32, #tpu.memory_space<any>> -> memref<128xf32, #tpu.memory_space<any>>
    %c0_i32_4 = arith.constant 0 : i32
    %8 = tpu.memref_slice %arg4[%c0_i32_1, %c0_i32_4] : memref<16x128xf32, #tpu.memory_space<vmem>> -> memref<1x128xf32, #tpu.memory_space<vmem>>
    %9 = tpu.memref_squeeze %8 : memref<1x128xf32, #tpu.memory_space<vmem>> -> memref<128xf32, #tpu.memory_space<vmem>>
    %10 = tpu.memref_slice %arg5[%c0_i32_2] : memref<16x!tpu.dma_semaphore, #tpu.memory_space<semaphore_mem>> -> memref<1x!tpu.dma_semaphore, #tpu.memory_space<semaphore_mem>>
    %11 = tpu.memref_squeeze %10 : memref<1x!tpu.dma_semaphore, #tpu.memory_space<semaphore_mem>> -> memref<!tpu.dma_semaphore, #tpu.memory_space<semaphore_mem>>
    tpu.enqueue_dma source(%7 : memref<128xf32, #tpu.memory_space<any>>) target(%9 : memref<128xf32, #tpu.memory_space<vmem>>) target_semaphore(%11 : memref<!tpu.dma_semaphore, #tpu.memory_space<semaphore_mem>>)
    %c1_i32 = arith.constant 1 : i32
    %12 = arith.addi %0, %c1_i32 : i32
    %13 = arith.index_cast %12 : i32 to index
    %14 = memref.load %arg1[%13] : memref<16xi32, #tpu.memory_space<smem>>
    %c0_i32_5 = arith.constant 0 : i32
    %15 = arith.maxsi %14, %c0_i32_5 : i32
    %c31_i32_6 = arith.constant 31 : i32
    %16 = arith.minsi %15, %c31_i32_6 : i32
    %c1_i32_7 = arith.constant 1 : i32
    %c1_i32_8 = arith.constant 1 : i32
    %c0_i32_9 = arith.constant 0 : i32
    %17 = tpu.memref_slice %arg2[%16, %c0_i32_9] : memref<32x128xf32, #tpu.memory_space<any>> -> memref<1x128xf32, #tpu.memory_space<any>>
    %18 = tpu.memref_squeeze %17 : memref<1x128xf32, #tpu.memory_space<any>> -> memref<128xf32, #tpu.memory_space<any>>
    %c0_i32_10 = arith.constant 0 : i32
    %19 = tpu.memref_slice %arg4[%c1_i32_7, %c0_i32_10] : memref<16x128xf32, #tpu.memory_space<vmem>> -> memref<1x128xf32, #tpu.memory_space<vmem>>
    %20 = tpu.memref_squeeze %19 : memref<1x128xf32, #tpu.memory_space<vmem>> -> memref<128xf32, #tpu.memory_space<vmem>>
    %21 = tpu.memref_slice %arg5[%c1_i32_8] : memref<16x!tpu.dma_semaphore, #tpu.memory_space<semaphore_mem>> -> memref<1x!tpu.dma_semaphore, #tpu.memory_space<semaphore_mem>>
    %22 = tpu.memref_squeeze %21 : memref<1x!tpu.dma_semaphore, #tpu.memory_space<semaphore_mem>> -> memref<!tpu.dma_semaphore, #tpu.memory_space<semaphore_mem>>
    tpu.enqueue_dma source(%18 : memref<128xf32, #tpu.memory_space<any>>) target(%20 : memref<128xf32, #tpu.memory_space<vmem>>) target_semaphore(%22 : memref<!tpu.dma_semaphore, #tpu.memory_space<semaphore_mem>>)
    %c2_i32 = arith.constant 2 : i32
    %23 = arith.addi %0, %c2_i32 : i32
    %24 = arith.index_cast %23 : i32 to index
    %25 = memref.load %arg1[%24] : memref<16xi32, #tpu.memory_space<smem>>
    %c0_i32_11 = arith.constant 0 : i32
    %26 = arith.maxsi %25, %c0_i32_11 : i32
    %c31_i32_12 = arith.constant 31 : i32
    %27 = arith.minsi %26, %c31_i32_12 : i32
    %c2_i32_13 = arith.constant 2 : i32
    %c2_i32_14 = arith.constant 2 : i32
    %c0_i32_15 = arith.constant 0 : i32
    %28 = tpu.memref_slice %arg2[%27, %c0_i32_15] : memref<32x128xf32, #tpu.memory_space<any>> -> memref<1x128xf32, #tpu.memory_space<any>>
    %29 = tpu.memref_squeeze %28 : memref<1x128xf32, #tpu.memory_space<any>> -> memref<128xf32, #tpu.memory_space<any>>
    %c0_i32_16 = arith.constant 0 : i32
    %30 = tpu.memref_slice %arg4[%c2_i32_13, %c0_i32_16] : memref<16x128xf32, #tpu.memory_space<vmem>> -> memref<1x128xf32, #tpu.memory_space<vmem>>
    %31 = tpu.memref_squeeze %30 : memref<1x128xf32, #tpu.memory_space<vmem>> -> memref<128xf32, #tpu.memory_space<vmem>>
    %32 = tpu.memref_slice %arg5[%c2_i32_14] : memref<16x!tpu.dma_semaphore, #tpu.memory_space<semaphore_mem>> -> memref<1x!tpu.dma_semaphore, #tpu.memory_space<semaphore_mem>>
    %33 = tpu.memref_squeeze %32 : memref<1x!tpu.dma_semaphore, #tpu.memory_space<semaphore_mem>> -> memref<!tpu.dma_semaphore, #tpu.memory_space<semaphore_mem>>
    tpu.enqueue_dma source(%29 : memref<128xf32, #tpu.memory_space<any>>) target(%31 : memref<128xf32, #tpu.memory_space<vmem>>) target_semaphore(%33 : memref<!tpu.dma_semaphore, #tpu.memory_space<semaphore_mem>>)
    %c3_i32 = arith.constant 3 : i32
    %34 = arith.addi %0, %c3_i32 : i32
    %35 = arith.index_cast %34 : i32 to index
    %36 = memref.load %arg1[%35] : memref<16xi32, #tpu.memory_space<smem>>
    %c0_i32_17 = arith.constant 0 : i32
    %37 = arith.maxsi %36, %c0_i32_17 : i32
    %c31_i32_18 = arith.constant 31 : i32
    %38 = arith.minsi %37, %c31_i32_18 : i32
    %c3_i32_19 = arith.constant 3 : i32
    %c3_i32_20 = arith.constant 3 : i32
    %c0_i32_21 = arith.constant 0 : i32
    %39 = tpu.memref_slice %arg2[%38, %c0_i32_21] : memref<32x128xf32, #tpu.memory_space<any>> -> memref<1x128xf32, #tpu.memory_space<any>>
    %40 = tpu.memref_squeeze %39 : memref<1x128xf32, #tpu.memory_space<any>> -> memref<128xf32, #tpu.memory_space<any>>
    %c0_i32_22 = arith.constant 0 : i32
    %41 = tpu.memref_slice %arg4[%c3_i32_19, %c0_i32_22] : memref<16x128xf32, #tpu.memory_space<vmem>> -> memref<1x128xf32, #tpu.memory_space<vmem>>
    %42 = tpu.memref_squeeze %41 : memref<1x128xf32, #tpu.memory_space<vmem>> -> memref<128xf32, #tpu.memory_space<vmem>>
    %43 = tpu.memref_slice %arg5[%c3_i32_20] : memref<16x!tpu.dma_semaphore, #tpu.memory_space<semaphore_mem>> -> memref<1x!tpu.dma_semaphore, #tpu.memory_space<semaphore_mem>>
    %44 = tpu.memref_squeeze %43 : memref<1x!tpu.dma_semaphore, #tpu.memory_space<semaphore_mem>> -> memref<!tpu.dma_semaphore, #tpu.memory_space<semaphore_mem>>
    tpu.enqueue_dma source(%40 : memref<128xf32, #tpu.memory_space<any>>) target(%42 : memref<128xf32, #tpu.memory_space<vmem>>) target_semaphore(%44 : memref<!tpu.dma_semaphore, #tpu.memory_space<semaphore_mem>>)
    %c4_i32 = arith.constant 4 : i32
    %45 = arith.addi %0, %c4_i32 : i32
    %46 = arith.index_cast %45 : i32 to index
    %47 = memref.load %arg1[%46] : memref<16xi32, #tpu.memory_space<smem>>
    %c0_i32_23 = arith.constant 0 : i32
    %48 = arith.maxsi %47, %c0_i32_23 : i32
    %c31_i32_24 = arith.constant 31 : i32
    %49 = arith.minsi %48, %c31_i32_24 : i32
    %c4_i32_25 = arith.constant 4 : i32
    %c4_i32_26 = arith.constant 4 : i32
    %c0_i32_27 = arith.constant 0 : i32
    %50 = tpu.memref_slice %arg2[%49, %c0_i32_27] : memref<32x128xf32, #tpu.memory_space<any>> -> memref<1x128xf32, #tpu.memory_space<any>>
    %51 = tpu.memref_squeeze %50 : memref<1x128xf32, #tpu.memory_space<any>> -> memref<128xf32, #tpu.memory_space<any>>
    %c0_i32_28 = arith.constant 0 : i32
    %52 = tpu.memref_slice %arg4[%c4_i32_25, %c0_i32_28] : memref<16x128xf32, #tpu.memory_space<vmem>> -> memref<1x128xf32, #tpu.memory_space<vmem>>
    %53 = tpu.memref_squeeze %52 : memref<1x128xf32, #tpu.memory_space<vmem>> -> memref<128xf32, #tpu.memory_space<vmem>>
    %54 = tpu.memref_slice %arg5[%c4_i32_26] : memref<16x!tpu.dma_semaphore, #tpu.memory_space<semaphore_mem>> -> memref<1x!tpu.dma_semaphore, #tpu.memory_space<semaphore_mem>>
    %55 = tpu.memref_squeeze %54 : memref<1x!tpu.dma_semaphore, #tpu.memory_space<semaphore_mem>> -> memref<!tpu.dma_semaphore, #tpu.memory_space<semaphore_mem>>
    tpu.enqueue_dma source(%51 : memref<128xf32, #tpu.memory_space<any>>) target(%53 : memref<128xf32, #tpu.memory_space<vmem>>) target_semaphore(%55 : memref<!tpu.dma_semaphore, #tpu.memory_space<semaphore_mem>>)
    %c5_i32 = arith.constant 5 : i32
    %56 = arith.addi %0, %c5_i32 : i32
    %57 = arith.index_cast %56 : i32 to index
    %58 = memref.load %arg1[%57] : memref<16xi32, #tpu.memory_space<smem>>
    %c0_i32_29 = arith.constant 0 : i32
    %59 = arith.maxsi %58, %c0_i32_29 : i32
    %c31_i32_30 = arith.constant 31 : i32
    %60 = arith.minsi %59, %c31_i32_30 : i32
    %c5_i32_31 = arith.constant 5 : i32
    %c5_i32_32 = arith.constant 5 : i32
    %c0_i32_33 = arith.constant 0 : i32
    %61 = tpu.memref_slice %arg2[%60, %c0_i32_33] : memref<32x128xf32, #tpu.memory_space<any>> -> memref<1x128xf32, #tpu.memory_space<any>>
    %62 = tpu.memref_squeeze %61 : memref<1x128xf32, #tpu.memory_space<any>> -> memref<128xf32, #tpu.memory_space<any>>
    %c0_i32_34 = arith.constant 0 : i32
    %63 = tpu.memref_slice %arg4[%c5_i32_31, %c0_i32_34] : memref<16x128xf32, #tpu.memory_space<vmem>> -> memref<1x128xf32, #tpu.memory_space<vmem>>
    %64 = tpu.memref_squeeze %63 : memref<1x128xf32, #tpu.memory_space<vmem>> -> memref<128xf32, #tpu.memory_space<vmem>>
    %65 = tpu.memref_slice %arg5[%c5_i32_32] : memref<16x!tpu.dma_semaphore, #tpu.memory_space<semaphore_mem>> -> memref<1x!tpu.dma_semaphore, #tpu.memory_space<semaphore_mem>>
    %66 = tpu.memref_squeeze %65 : memref<1x!tpu.dma_semaphore, #tpu.memory_space<semaphore_mem>> -> memref<!tpu.dma_semaphore, #tpu.memory_space<semaphore_mem>>
    tpu.enqueue_dma source(%62 : memref<128xf32, #tpu.memory_space<any>>) target(%64 : memref<128xf32, #tpu.memory_space<vmem>>) target_semaphore(%66 : memref<!tpu.dma_semaphore, #tpu.memory_space<semaphore_mem>>)
    %c6_i32 = arith.constant 6 : i32
    %67 = arith.addi %0, %c6_i32 : i32
    %68 = arith.index_cast %67 : i32 to index
    %69 = memref.load %arg1[%68] : memref<16xi32, #tpu.memory_space<smem>>
    %c0_i32_35 = arith.constant 0 : i32
    %70 = arith.maxsi %69, %c0_i32_35 : i32
    %c31_i32_36 = arith.constant 31 : i32
    %71 = arith.minsi %70, %c31_i32_36 : i32
    %c6_i32_37 = arith.constant 6 : i32
    %c6_i32_38 = arith.constant 6 : i32
    %c0_i32_39 = arith.constant 0 : i32
    %72 = tpu.memref_slice %arg2[%71, %c0_i32_39] : memref<32x128xf32, #tpu.memory_space<any>> -> memref<1x128xf32, #tpu.memory_space<any>>
    %73 = tpu.memref_squeeze %72 : memref<1x128xf32, #tpu.memory_space<any>> -> memref<128xf32, #tpu.memory_space<any>>
    %c0_i32_40 = arith.constant 0 : i32
    %74 = tpu.memref_slice %arg4[%c6_i32_37, %c0_i32_40] : memref<16x128xf32, #tpu.memory_space<vmem>> -> memref<1x128xf32, #tpu.memory_space<vmem>>
    %75 = tpu.memref_squeeze %74 : memref<1x128xf32, #tpu.memory_space<vmem>> -> memref<128xf32, #tpu.memory_space<vmem>>
    %76 = tpu.memref_slice %arg5[%c6_i32_38] : memref<16x!tpu.dma_semaphore, #tpu.memory_space<semaphore_mem>> -> memref<1x!tpu.dma_semaphore, #tpu.memory_space<semaphore_mem>>
    %77 = tpu.memref_squeeze %76 : memref<1x!tpu.dma_semaphore, #tpu.memory_space<semaphore_mem>> -> memref<!tpu.dma_semaphore, #tpu.memory_space<semaphore_mem>>
    tpu.enqueue_dma source(%73 : memref<128xf32, #tpu.memory_space<any>>) target(%75 : memref<128xf32, #tpu.memory_space<vmem>>) target_semaphore(%77 : memref<!tpu.dma_semaphore, #tpu.memory_space<semaphore_mem>>)
    %c7_i32 = arith.constant 7 : i32
    %78 = arith.addi %0, %c7_i32 : i32
    %79 = arith.index_cast %78 : i32 to index
    %80 = memref.load %arg1[%79] : memref<16xi32, #tpu.memory_space<smem>>
    %c0_i32_41 = arith.constant 0 : i32
    %81 = arith.maxsi %80, %c0_i32_41 : i32
    %c31_i32_42 = arith.constant 31 : i32
    %82 = arith.minsi %81, %c31_i32_42 : i32
    %c7_i32_43 = arith.constant 7 : i32
    %c7_i32_44 = arith.constant 7 : i32
    %c0_i32_45 = arith.constant 0 : i32
    %83 = tpu.memref_slice %arg2[%82, %c0_i32_45] : memref<32x128xf32, #tpu.memory_space<any>> -> memref<1x128xf32, #tpu.memory_space<any>>
    %84 = tpu.memref_squeeze %83 : memref<1x128xf32, #tpu.memory_space<any>> -> memref<128xf32, #tpu.memory_space<any>>
    %c0_i32_46 = arith.constant 0 : i32
    %85 = tpu.memref_slice %arg4[%c7_i32_43, %c0_i32_46] : memref<16x128xf32, #tpu.memory_space<vmem>> -> memref<1x128xf32, #tpu.memory_space<vmem>>
    %86 = tpu.memref_squeeze %85 : memref<1x128xf32, #tpu.memory_space<vmem>> -> memref<128xf32, #tpu.memory_space<vmem>>
    %87 = tpu.memref_slice %arg5[%c7_i32_44] : memref<16x!tpu.dma_semaphore, #tpu.memory_space<semaphore_mem>> -> memref<1x!tpu.dma_semaphore, #tpu.memory_space<semaphore_mem>>
    %88 = tpu.memref_squeeze %87 : memref<1x!tpu.dma_semaphore, #tpu.memory_space<semaphore_mem>> -> memref<!tpu.dma_semaphore, #tpu.memory_space<semaphore_mem>>
    tpu.enqueue_dma source(%84 : memref<128xf32, #tpu.memory_space<any>>) target(%86 : memref<128xf32, #tpu.memory_space<vmem>>) target_semaphore(%88 : memref<!tpu.dma_semaphore, #tpu.memory_space<semaphore_mem>>)
    %c8_i32 = arith.constant 8 : i32
    %89 = arith.addi %0, %c8_i32 : i32
    %90 = arith.index_cast %89 : i32 to index
    %91 = memref.load %arg1[%90] : memref<16xi32, #tpu.memory_space<smem>>
    %c0_i32_47 = arith.constant 0 : i32
    %92 = arith.maxsi %91, %c0_i32_47 : i32
    %c31_i32_48 = arith.constant 31 : i32
    %93 = arith.minsi %92, %c31_i32_48 : i32
    %c8_i32_49 = arith.constant 8 : i32
    %c8_i32_50 = arith.constant 8 : i32
    %c0_i32_51 = arith.constant 0 : i32
    %94 = tpu.memref_slice %arg2[%93, %c0_i32_51] : memref<32x128xf32, #tpu.memory_space<any>> -> memref<1x128xf32, #tpu.memory_space<any>>
    %95 = tpu.memref_squeeze %94 : memref<1x128xf32, #tpu.memory_space<any>> -> memref<128xf32, #tpu.memory_space<any>>
    %c0_i32_52 = arith.constant 0 : i32
    %96 = tpu.memref_slice %arg4[%c8_i32_49, %c0_i32_52] : memref<16x128xf32, #tpu.memory_space<vmem>> -> memref<1x128xf32, #tpu.memory_space<vmem>>
    %97 = tpu.memref_squeeze %96 : memref<1x128xf32, #tpu.memory_space<vmem>> -> memref<128xf32, #tpu.memory_space<vmem>>
    %98 = tpu.memref_slice %arg5[%c8_i32_50] : memref<16x!tpu.dma_semaphore, #tpu.memory_space<semaphore_mem>> -> memref<1x!tpu.dma_semaphore, #tpu.memory_space<semaphore_mem>>
    %99 = tpu.memref_squeeze %98 : memref<1x!tpu.dma_semaphore, #tpu.memory_space<semaphore_mem>> -> memref<!tpu.dma_semaphore, #tpu.memory_space<semaphore_mem>>
    tpu.enqueue_dma source(%95 : memref<128xf32, #tpu.memory_space<any>>) target(%97 : memref<128xf32, #tpu.memory_space<vmem>>) target_semaphore(%99 : memref<!tpu.dma_semaphore, #tpu.memory_space<semaphore_mem>>)
    %c9_i32 = arith.constant 9 : i32
    %100 = arith.addi %0, %c9_i32 : i32
    %101 = arith.index_cast %100 : i32 to index
    %102 = memref.load %arg1[%101] : memref<16xi32, #tpu.memory_space<smem>>
    %c0_i32_53 = arith.constant 0 : i32
    %103 = arith.maxsi %102, %c0_i32_53 : i32
    %c31_i32_54 = arith.constant 31 : i32
    %104 = arith.minsi %103, %c31_i32_54 : i32
    %c9_i32_55 = arith.constant 9 : i32
    %c9_i32_56 = arith.constant 9 : i32
    %c0_i32_57 = arith.constant 0 : i32
    %105 = tpu.memref_slice %arg2[%104, %c0_i32_57] : memref<32x128xf32, #tpu.memory_space<any>> -> memref<1x128xf32, #tpu.memory_space<any>>
    %106 = tpu.memref_squeeze %105 : memref<1x128xf32, #tpu.memory_space<any>> -> memref<128xf32, #tpu.memory_space<any>>
    %c0_i32_58 = arith.constant 0 : i32
    %107 = tpu.memref_slice %arg4[%c9_i32_55, %c0_i32_58] : memref<16x128xf32, #tpu.memory_space<vmem>> -> memref<1x128xf32, #tpu.memory_space<vmem>>
    %108 = tpu.memref_squeeze %107 : memref<1x128xf32, #tpu.memory_space<vmem>> -> memref<128xf32, #tpu.memory_space<vmem>>
    %109 = tpu.memref_slice %arg5[%c9_i32_56] : memref<16x!tpu.dma_semaphore, #tpu.memory_space<semaphore_mem>> -> memref<1x!tpu.dma_semaphore, #tpu.memory_space<semaphore_mem>>
    %110 = tpu.memref_squeeze %109 : memref<1x!tpu.dma_semaphore, #tpu.memory_space<semaphore_mem>> -> memref<!tpu.dma_semaphore, #tpu.memory_space<semaphore_mem>>
    tpu.enqueue_dma source(%106 : memref<128xf32, #tpu.memory_space<any>>) target(%108 : memref<128xf32, #tpu.memory_space<vmem>>) target_semaphore(%110 : memref<!tpu.dma_semaphore, #tpu.memory_space<semaphore_mem>>)
    %c10_i32 = arith.constant 10 : i32
    %111 = arith.addi %0, %c10_i32 : i32
    %112 = arith.index_cast %111 : i32 to index
    %113 = memref.load %arg1[%112] : memref<16xi32, #tpu.memory_space<smem>>
    %c0_i32_59 = arith.constant 0 : i32
    %114 = arith.maxsi %113, %c0_i32_59 : i32
    %c31_i32_60 = arith.constant 31 : i32
    %115 = arith.minsi %114, %c31_i32_60 : i32
    %c10_i32_61 = arith.constant 10 : i32
    %c10_i32_62 = arith.constant 10 : i32
    %c0_i32_63 = arith.constant 0 : i32
    %116 = tpu.memref_slice %arg2[%115, %c0_i32_63] : memref<32x128xf32, #tpu.memory_space<any>> -> memref<1x128xf32, #tpu.memory_space<any>>
    %117 = tpu.memref_squeeze %116 : memref<1x128xf32, #tpu.memory_space<any>> -> memref<128xf32, #tpu.memory_space<any>>
    %c0_i32_64 = arith.constant 0 : i32
    %118 = tpu.memref_slice %arg4[%c10_i32_61, %c0_i32_64] : memref<16x128xf32, #tpu.memory_space<vmem>> -> memref<1x128xf32, #tpu.memory_space<vmem>>
    %119 = tpu.memref_squeeze %118 : memref<1x128xf32, #tpu.memory_space<vmem>> -> memref<128xf32, #tpu.memory_space<vmem>>
    %120 = tpu.memref_slice %arg5[%c10_i32_62] : memref<16x!tpu.dma_semaphore, #tpu.memory_space<semaphore_mem>> -> memref<1x!tpu.dma_semaphore, #tpu.memory_space<semaphore_mem>>
    %121 = tpu.memref_squeeze %120 : memref<1x!tpu.dma_semaphore, #tpu.memory_space<semaphore_mem>> -> memref<!tpu.dma_semaphore, #tpu.memory_space<semaphore_mem>>
    tpu.enqueue_dma source(%117 : memref<128xf32, #tpu.memory_space<any>>) target(%119 : memref<128xf32, #tpu.memory_space<vmem>>) target_semaphore(%121 : memref<!tpu.dma_semaphore, #tpu.memory_space<semaphore_mem>>)
    %c11_i32 = arith.constant 11 : i32
    %122 = arith.addi %0, %c11_i32 : i32
    %123 = arith.index_cast %122 : i32 to index
    %124 = memref.load %arg1[%123] : memref<16xi32, #tpu.memory_space<smem>>
    %c0_i32_65 = arith.constant 0 : i32
    %125 = arith.maxsi %124, %c0_i32_65 : i32
    %c31_i32_66 = arith.constant 31 : i32
    %126 = arith.minsi %125, %c31_i32_66 : i32
    %c11_i32_67 = arith.constant 11 : i32
    %c11_i32_68 = arith.constant 11 : i32
    %c0_i32_69 = arith.constant 0 : i32
    %127 = tpu.memref_slice %arg2[%126, %c0_i32_69] : memref<32x128xf32, #tpu.memory_space<any>> -> memref<1x128xf32, #tpu.memory_space<any>>
    %128 = tpu.memref_squeeze %127 : memref<1x128xf32, #tpu.memory_space<any>> -> memref<128xf32, #tpu.memory_space<any>>
    %c0_i32_70 = arith.constant 0 : i32
    %129 = tpu.memref_slice %arg4[%c11_i32_67, %c0_i32_70] : memref<16x128xf32, #tpu.memory_space<vmem>> -> memref<1x128xf32, #tpu.memory_space<vmem>>
    %130 = tpu.memref_squeeze %129 : memref<1x128xf32, #tpu.memory_space<vmem>> -> memref<128xf32, #tpu.memory_space<vmem>>
    %131 = tpu.memref_slice %arg5[%c11_i32_68] : memref<16x!tpu.dma_semaphore, #tpu.memory_space<semaphore_mem>> -> memref<1x!tpu.dma_semaphore, #tpu.memory_space<semaphore_mem>>
    %132 = tpu.memref_squeeze %131 : memref<1x!tpu.dma_semaphore, #tpu.memory_space<semaphore_mem>> -> memref<!tpu.dma_semaphore, #tpu.memory_space<semaphore_mem>>
    tpu.enqueue_dma source(%128 : memref<128xf32, #tpu.memory_space<any>>) target(%130 : memref<128xf32, #tpu.memory_space<vmem>>) target_semaphore(%132 : memref<!tpu.dma_semaphore, #tpu.memory_space<semaphore_mem>>)
    %c12_i32 = arith.constant 12 : i32
    %133 = arith.addi %0, %c12_i32 : i32
    %134 = arith.index_cast %133 : i32 to index
    %135 = memref.load %arg1[%134] : memref<16xi32, #tpu.memory_space<smem>>
    %c0_i32_71 = arith.constant 0 : i32
    %136 = arith.maxsi %135, %c0_i32_71 : i32
    %c31_i32_72 = arith.constant 31 : i32
    %137 = arith.minsi %136, %c31_i32_72 : i32
    %c12_i32_73 = arith.constant 12 : i32
    %c12_i32_74 = arith.constant 12 : i32
    %c0_i32_75 = arith.constant 0 : i32
    %138 = tpu.memref_slice %arg2[%137, %c0_i32_75] : memref<32x128xf32, #tpu.memory_space<any>> -> memref<1x128xf32, #tpu.memory_space<any>>
    %139 = tpu.memref_squeeze %138 : memref<1x128xf32, #tpu.memory_space<any>> -> memref<128xf32, #tpu.memory_space<any>>
    %c0_i32_76 = arith.constant 0 : i32
    %140 = tpu.memref_slice %arg4[%c12_i32_73, %c0_i32_76] : memref<16x128xf32, #tpu.memory_space<vmem>> -> memref<1x128xf32, #tpu.memory_space<vmem>>
    %141 = tpu.memref_squeeze %140 : memref<1x128xf32, #tpu.memory_space<vmem>> -> memref<128xf32, #tpu.memory_space<vmem>>
    %142 = tpu.memref_slice %arg5[%c12_i32_74] : memref<16x!tpu.dma_semaphore, #tpu.memory_space<semaphore_mem>> -> memref<1x!tpu.dma_semaphore, #tpu.memory_space<semaphore_mem>>
    %143 = tpu.memref_squeeze %142 : memref<1x!tpu.dma_semaphore, #tpu.memory_space<semaphore_mem>> -> memref<!tpu.dma_semaphore, #tpu.memory_space<semaphore_mem>>
    tpu.enqueue_dma source(%139 : memref<128xf32, #tpu.memory_space<any>>) target(%141 : memref<128xf32, #tpu.memory_space<vmem>>) target_semaphore(%143 : memref<!tpu.dma_semaphore, #tpu.memory_space<semaphore_mem>>)
    %c13_i32 = arith.constant 13 : i32
    %144 = arith.addi %0, %c13_i32 : i32
    %145 = arith.index_cast %144 : i32 to index
    %146 = memref.load %arg1[%145] : memref<16xi32, #tpu.memory_space<smem>>
    %c0_i32_77 = arith.constant 0 : i32
    %147 = arith.maxsi %146, %c0_i32_77 : i32
    %c31_i32_78 = arith.constant 31 : i32
    %148 = arith.minsi %147, %c31_i32_78 : i32
    %c13_i32_79 = arith.constant 13 : i32
    %c13_i32_80 = arith.constant 13 : i32
    %c0_i32_81 = arith.constant 0 : i32
    %149 = tpu.memref_slice %arg2[%148, %c0_i32_81] : memref<32x128xf32, #tpu.memory_space<any>> -> memref<1x128xf32, #tpu.memory_space<any>>
    %150 = tpu.memref_squeeze %149 : memref<1x128xf32, #tpu.memory_space<any>> -> memref<128xf32, #tpu.memory_space<any>>
    %c0_i32_82 = arith.constant 0 : i32
    %151 = tpu.memref_slice %arg4[%c13_i32_79, %c0_i32_82] : memref<16x128xf32, #tpu.memory_space<vmem>> -> memref<1x128xf32, #tpu.memory_space<vmem>>
    %152 = tpu.memref_squeeze %151 : memref<1x128xf32, #tpu.memory_space<vmem>> -> memref<128xf32, #tpu.memory_space<vmem>>
    %153 = tpu.memref_slice %arg5[%c13_i32_80] : memref<16x!tpu.dma_semaphore, #tpu.memory_space<semaphore_mem>> -> memref<1x!tpu.dma_semaphore, #tpu.memory_space<semaphore_mem>>
    %154 = tpu.memref_squeeze %153 : memref<1x!tpu.dma_semaphore, #tpu.memory_space<semaphore_mem>> -> memref<!tpu.dma_semaphore, #tpu.memory_space<semaphore_mem>>
    tpu.enqueue_dma source(%150 : memref<128xf32, #tpu.memory_space<any>>) target(%152 : memref<128xf32, #tpu.memory_space<vmem>>) target_semaphore(%154 : memref<!tpu.dma_semaphore, #tpu.memory_space<semaphore_mem>>)
    %c14_i32 = arith.constant 14 : i32
    %155 = arith.addi %0, %c14_i32 : i32
    %156 = arith.index_cast %155 : i32 to index
    %157 = memref.load %arg1[%156] : memref<16xi32, #tpu.memory_space<smem>>
    %c0_i32_83 = arith.constant 0 : i32
    %158 = arith.maxsi %157, %c0_i32_83 : i32
    %c31_i32_84 = arith.constant 31 : i32
    %159 = arith.minsi %158, %c31_i32_84 : i32
    %c14_i32_85 = arith.constant 14 : i32
    %c14_i32_86 = arith.constant 14 : i32
    %c0_i32_87 = arith.constant 0 : i32
    %160 = tpu.memref_slice %arg2[%159, %c0_i32_87] : memref<32x128xf32, #tpu.memory_space<any>> -> memref<1x128xf32, #tpu.memory_space<any>>
    %161 = tpu.memref_squeeze %160 : memref<1x128xf32, #tpu.memory_space<any>> -> memref<128xf32, #tpu.memory_space<any>>
    %c0_i32_88 = arith.constant 0 : i32
    %162 = tpu.memref_slice %arg4[%c14_i32_85, %c0_i32_88] : memref<16x128xf32, #tpu.memory_space<vmem>> -> memref<1x128xf32, #tpu.memory_space<vmem>>
    %163 = tpu.memref_squeeze %162 : memref<1x128xf32, #tpu.memory_space<vmem>> -> memref<128xf32, #tpu.memory_space<vmem>>
    %164 = tpu.memref_slice %arg5[%c14_i32_86] : memref<16x!tpu.dma_semaphore, #tpu.memory_space<semaphore_mem>> -> memref<1x!tpu.dma_semaphore, #tpu.memory_space<semaphore_mem>>
    %165 = tpu.memref_squeeze %164 : memref<1x!tpu.dma_semaphore, #tpu.memory_space<semaphore_mem>> -> memref<!tpu.dma_semaphore, #tpu.memory_space<semaphore_mem>>
    tpu.enqueue_dma source(%161 : memref<128xf32, #tpu.memory_space<any>>) target(%163 : memref<128xf32, #tpu.memory_space<vmem>>) target_semaphore(%165 : memref<!tpu.dma_semaphore, #tpu.memory_space<semaphore_mem>>)
    %c15_i32 = arith.constant 15 : i32
    %166 = arith.addi %0, %c15_i32 : i32
    %167 = arith.index_cast %166 : i32 to index
    %168 = memref.load %arg1[%167] : memref<16xi32, #tpu.memory_space<smem>>
    %c0_i32_89 = arith.constant 0 : i32
    %169 = arith.maxsi %168, %c0_i32_89 : i32
    %c31_i32_90 = arith.constant 31 : i32
    %170 = arith.minsi %169, %c31_i32_90 : i32
    %c15_i32_91 = arith.constant 15 : i32
    %c15_i32_92 = arith.constant 15 : i32
    %c0_i32_93 = arith.constant 0 : i32
    %171 = tpu.memref_slice %arg2[%170, %c0_i32_93] : memref<32x128xf32, #tpu.memory_space<any>> -> memref<1x128xf32, #tpu.memory_space<any>>
    %172 = tpu.memref_squeeze %171 : memref<1x128xf32, #tpu.memory_space<any>> -> memref<128xf32, #tpu.memory_space<any>>
    %c0_i32_94 = arith.constant 0 : i32
    %173 = tpu.memref_slice %arg4[%c15_i32_91, %c0_i32_94] : memref<16x128xf32, #tpu.memory_space<vmem>> -> memref<1x128xf32, #tpu.memory_space<vmem>>
    %174 = tpu.memref_squeeze %173 : memref<1x128xf32, #tpu.memory_space<vmem>> -> memref<128xf32, #tpu.memory_space<vmem>>
    %175 = tpu.memref_slice %arg5[%c15_i32_92] : memref<16x!tpu.dma_semaphore, #tpu.memory_space<semaphore_mem>> -> memref<1x!tpu.dma_semaphore, #tpu.memory_space<semaphore_mem>>
    %176 = tpu.memref_squeeze %175 : memref<1x!tpu.dma_semaphore, #tpu.memory_space<semaphore_mem>> -> memref<!tpu.dma_semaphore, #tpu.memory_space<semaphore_mem>>
    tpu.enqueue_dma source(%172 : memref<128xf32, #tpu.memory_space<any>>) target(%174 : memref<128xf32, #tpu.memory_space<vmem>>) target_semaphore(%176 : memref<!tpu.dma_semaphore, #tpu.memory_space<semaphore_mem>>)
    %c0_i32_95 = arith.constant 0 : i32
    %c0_i32_96 = arith.constant 0 : i32
    %c0_i32_97 = arith.constant 0 : i32
    %177 = tpu.memref_slice %arg2[%5, %c0_i32_97] : memref<32x128xf32, #tpu.memory_space<any>> -> memref<1x128xf32, #tpu.memory_space<any>>
    %178 = tpu.memref_squeeze %177 : memref<1x128xf32, #tpu.memory_space<any>> -> memref<128xf32, #tpu.memory_space<any>>
    %c0_i32_98 = arith.constant 0 : i32
    %179 = tpu.memref_slice %arg4[%c0_i32_95, %c0_i32_98] : memref<16x128xf32, #tpu.memory_space<vmem>> -> memref<1x128xf32, #tpu.memory_space<vmem>>
    %180 = tpu.memref_squeeze %179 : memref<1x128xf32, #tpu.memory_space<vmem>> -> memref<128xf32, #tpu.memory_space<vmem>>
    %181 = tpu.memref_slice %arg5[%c0_i32_96] : memref<16x!tpu.dma_semaphore, #tpu.memory_space<semaphore_mem>> -> memref<1x!tpu.dma_semaphore, #tpu.memory_space<semaphore_mem>>
    %182 = tpu.memref_squeeze %181 : memref<1x!tpu.dma_semaphore, #tpu.memory_space<semaphore_mem>> -> memref<!tpu.dma_semaphore, #tpu.memory_space<semaphore_mem>>
    tpu.wait_dma2 semaphore(%182 : memref<!tpu.dma_semaphore, #tpu.memory_space<semaphore_mem>>) src(%178 : memref<128xf32, #tpu.memory_space<any>>) dst(%180 : memref<128xf32, #tpu.memory_space<vmem>>)
    %c1_i32_99 = arith.constant 1 : i32
    %c1_i32_100 = arith.constant 1 : i32
    %c0_i32_101 = arith.constant 0 : i32
    %183 = tpu.memref_slice %arg2[%16, %c0_i32_101] : memref<32x128xf32, #tpu.memory_space<any>> -> memref<1x128xf32, #tpu.memory_space<any>>
    %184 = tpu.memref_squeeze %183 : memref<1x128xf32, #tpu.memory_space<any>> -> memref<128xf32, #tpu.memory_space<any>>
    %c0_i32_102 = arith.constant 0 : i32
    %185 = tpu.memref_slice %arg4[%c1_i32_99, %c0_i32_102] : memref<16x128xf32, #tpu.memory_space<vmem>> -> memref<1x128xf32, #tpu.memory_space<vmem>>
    %186 = tpu.memref_squeeze %185 : memref<1x128xf32, #tpu.memory_space<vmem>> -> memref<128xf32, #tpu.memory_space<vmem>>
    %187 = tpu.memref_slice %arg5[%c1_i32_100] : memref<16x!tpu.dma_semaphore, #tpu.memory_space<semaphore_mem>> -> memref<1x!tpu.dma_semaphore, #tpu.memory_space<semaphore_mem>>
    %188 = tpu.memref_squeeze %187 : memref<1x!tpu.dma_semaphore, #tpu.memory_space<semaphore_mem>> -> memref<!tpu.dma_semaphore, #tpu.memory_space<semaphore_mem>>
    tpu.wait_dma2 semaphore(%188 : memref<!tpu.dma_semaphore, #tpu.memory_space<semaphore_mem>>) src(%184 : memref<128xf32, #tpu.memory_space<any>>) dst(%186 : memref<128xf32, #tpu.memory_space<vmem>>)
    %c2_i32_103 = arith.constant 2 : i32
    %c2_i32_104 = arith.constant 2 : i32
    %c0_i32_105 = arith.constant 0 : i32
    %189 = tpu.memref_slice %arg2[%27, %c0_i32_105] : memref<32x128xf32, #tpu.memory_space<any>> -> memref<1x128xf32, #tpu.memory_space<any>>
    %190 = tpu.memref_squeeze %189 : memref<1x128xf32, #tpu.memory_space<any>> -> memref<128xf32, #tpu.memory_space<any>>
    %c0_i32_106 = arith.constant 0 : i32
    %191 = tpu.memref_slice %arg4[%c2_i32_103, %c0_i32_106] : memref<16x128xf32, #tpu.memory_space<vmem>> -> memref<1x128xf32, #tpu.memory_space<vmem>>
    %192 = tpu.memref_squeeze %191 : memref<1x128xf32, #tpu.memory_space<vmem>> -> memref<128xf32, #tpu.memory_space<vmem>>
    %193 = tpu.memref_slice %arg5[%c2_i32_104] : memref<16x!tpu.dma_semaphore, #tpu.memory_space<semaphore_mem>> -> memref<1x!tpu.dma_semaphore, #tpu.memory_space<semaphore_mem>>
    %194 = tpu.memref_squeeze %193 : memref<1x!tpu.dma_semaphore, #tpu.memory_space<semaphore_mem>> -> memref<!tpu.dma_semaphore, #tpu.memory_space<semaphore_mem>>
    tpu.wait_dma2 semaphore(%194 : memref<!tpu.dma_semaphore, #tpu.memory_space<semaphore_mem>>) src(%190 : memref<128xf32, #tpu.memory_space<any>>) dst(%192 : memref<128xf32, #tpu.memory_space<vmem>>)
    %c3_i32_107 = arith.constant 3 : i32
    %c3_i32_108 = arith.constant 3 : i32
    %c0_i32_109 = arith.constant 0 : i32
    %195 = tpu.memref_slice %arg2[%38, %c0_i32_109] : memref<32x128xf32, #tpu.memory_space<any>> -> memref<1x128xf32, #tpu.memory_space<any>>
    %196 = tpu.memref_squeeze %195 : memref<1x128xf32, #tpu.memory_space<any>> -> memref<128xf32, #tpu.memory_space<any>>
    %c0_i32_110 = arith.constant 0 : i32
    %197 = tpu.memref_slice %arg4[%c3_i32_107, %c0_i32_110] : memref<16x128xf32, #tpu.memory_space<vmem>> -> memref<1x128xf32, #tpu.memory_space<vmem>>
    %198 = tpu.memref_squeeze %197 : memref<1x128xf32, #tpu.memory_space<vmem>> -> memref<128xf32, #tpu.memory_space<vmem>>
    %199 = tpu.memref_slice %arg5[%c3_i32_108] : memref<16x!tpu.dma_semaphore, #tpu.memory_space<semaphore_mem>> -> memref<1x!tpu.dma_semaphore, #tpu.memory_space<semaphore_mem>>
    %200 = tpu.memref_squeeze %199 : memref<1x!tpu.dma_semaphore, #tpu.memory_space<semaphore_mem>> -> memref<!tpu.dma_semaphore, #tpu.memory_space<semaphore_mem>>
    tpu.wait_dma2 semaphore(%200 : memref<!tpu.dma_semaphore, #tpu.memory_space<semaphore_mem>>) src(%196 : memref<128xf32, #tpu.memory_space<any>>) dst(%198 : memref<128xf32, #tpu.memory_space<vmem>>)
    %c4_i32_111 = arith.constant 4 : i32
    %c4_i32_112 = arith.constant 4 : i32
    %c0_i32_113 = arith.constant 0 : i32
    %201 = tpu.memref_slice %arg2[%49, %c0_i32_113] : memref<32x128xf32, #tpu.memory_space<any>> -> memref<1x128xf32, #tpu.memory_space<any>>
    %202 = tpu.memref_squeeze %201 : memref<1x128xf32, #tpu.memory_space<any>> -> memref<128xf32, #tpu.memory_space<any>>
    %c0_i32_114 = arith.constant 0 : i32
    %203 = tpu.memref_slice %arg4[%c4_i32_111, %c0_i32_114] : memref<16x128xf32, #tpu.memory_space<vmem>> -> memref<1x128xf32, #tpu.memory_space<vmem>>
    %204 = tpu.memref_squeeze %203 : memref<1x128xf32, #tpu.memory_space<vmem>> -> memref<128xf32, #tpu.memory_space<vmem>>
    %205 = tpu.memref_slice %arg5[%c4_i32_112] : memref<16x!tpu.dma_semaphore, #tpu.memory_space<semaphore_mem>> -> memref<1x!tpu.dma_semaphore, #tpu.memory_space<semaphore_mem>>
    %206 = tpu.memref_squeeze %205 : memref<1x!tpu.dma_semaphore, #tpu.memory_space<semaphore_mem>> -> memref<!tpu.dma_semaphore, #tpu.memory_space<semaphore_mem>>
    tpu.wait_dma2 semaphore(%206 : memref<!tpu.dma_semaphore, #tpu.memory_space<semaphore_mem>>) src(%202 : memref<128xf32, #tpu.memory_space<any>>) dst(%204 : memref<128xf32, #tpu.memory_space<vmem>>)
    %c5_i32_115 = arith.constant 5 : i32
    %c5_i32_116 = arith.constant 5 : i32
    %c0_i32_117 = arith.constant 0 : i32
    %207 = tpu.memref_slice %arg2[%60, %c0_i32_117] : memref<32x128xf32, #tpu.memory_space<any>> -> memref<1x128xf32, #tpu.memory_space<any>>
    %208 = tpu.memref_squeeze %207 : memref<1x128xf32, #tpu.memory_space<any>> -> memref<128xf32, #tpu.memory_space<any>>
    %c0_i32_118 = arith.constant 0 : i32
    %209 = tpu.memref_slice %arg4[%c5_i32_115, %c0_i32_118] : memref<16x128xf32, #tpu.memory_space<vmem>> -> memref<1x128xf32, #tpu.memory_space<vmem>>
    %210 = tpu.memref_squeeze %209 : memref<1x128xf32, #tpu.memory_space<vmem>> -> memref<128xf32, #tpu.memory_space<vmem>>
    %211 = tpu.memref_slice %arg5[%c5_i32_116] : memref<16x!tpu.dma_semaphore, #tpu.memory_space<semaphore_mem>> -> memref<1x!tpu.dma_semaphore, #tpu.memory_space<semaphore_mem>>
    %212 = tpu.memref_squeeze %211 : memref<1x!tpu.dma_semaphore, #tpu.memory_space<semaphore_mem>> -> memref<!tpu.dma_semaphore, #tpu.memory_space<semaphore_mem>>
    tpu.wait_dma2 semaphore(%212 : memref<!tpu.dma_semaphore, #tpu.memory_space<semaphore_mem>>) src(%208 : memref<128xf32, #tpu.memory_space<any>>) dst(%210 : memref<128xf32, #tpu.memory_space<vmem>>)
    %c6_i32_119 = arith.constant 6 : i32
    %c6_i32_120 = arith.constant 6 : i32
    %c0_i32_121 = arith.constant 0 : i32
    %213 = tpu.memref_slice %arg2[%71, %c0_i32_121] : memref<32x128xf32, #tpu.memory_space<any>> -> memref<1x128xf32, #tpu.memory_space<any>>
    %214 = tpu.memref_squeeze %213 : memref<1x128xf32, #tpu.memory_space<any>> -> memref<128xf32, #tpu.memory_space<any>>
    %c0_i32_122 = arith.constant 0 : i32
    %215 = tpu.memref_slice %arg4[%c6_i32_119, %c0_i32_122] : memref<16x128xf32, #tpu.memory_space<vmem>> -> memref<1x128xf32, #tpu.memory_space<vmem>>
    %216 = tpu.memref_squeeze %215 : memref<1x128xf32, #tpu.memory_space<vmem>> -> memref<128xf32, #tpu.memory_space<vmem>>
    %217 = tpu.memref_slice %arg5[%c6_i32_120] : memref<16x!tpu.dma_semaphore, #tpu.memory_space<semaphore_mem>> -> memref<1x!tpu.dma_semaphore, #tpu.memory_space<semaphore_mem>>
    %218 = tpu.memref_squeeze %217 : memref<1x!tpu.dma_semaphore, #tpu.memory_space<semaphore_mem>> -> memref<!tpu.dma_semaphore, #tpu.memory_space<semaphore_mem>>
    tpu.wait_dma2 semaphore(%218 : memref<!tpu.dma_semaphore, #tpu.memory_space<semaphore_mem>>) src(%214 : memref<128xf32, #tpu.memory_space<any>>) dst(%216 : memref<128xf32, #tpu.memory_space<vmem>>)
    %c7_i32_123 = arith.constant 7 : i32
    %c7_i32_124 = arith.constant 7 : i32
    %c0_i32_125 = arith.constant 0 : i32
    %219 = tpu.memref_slice %arg2[%82, %c0_i32_125] : memref<32x128xf32, #tpu.memory_space<any>> -> memref<1x128xf32, #tpu.memory_space<any>>
    %220 = tpu.memref_squeeze %219 : memref<1x128xf32, #tpu.memory_space<any>> -> memref<128xf32, #tpu.memory_space<any>>
    %c0_i32_126 = arith.constant 0 : i32
    %221 = tpu.memref_slice %arg4[%c7_i32_123, %c0_i32_126] : memref<16x128xf32, #tpu.memory_space<vmem>> -> memref<1x128xf32, #tpu.memory_space<vmem>>
    %222 = tpu.memref_squeeze %221 : memref<1x128xf32, #tpu.memory_space<vmem>> -> memref<128xf32, #tpu.memory_space<vmem>>
    %223 = tpu.memref_slice %arg5[%c7_i32_124] : memref<16x!tpu.dma_semaphore, #tpu.memory_space<semaphore_mem>> -> memref<1x!tpu.dma_semaphore, #tpu.memory_space<semaphore_mem>>
    %224 = tpu.memref_squeeze %223 : memref<1x!tpu.dma_semaphore, #tpu.memory_space<semaphore_mem>> -> memref<!tpu.dma_semaphore, #tpu.memory_space<semaphore_mem>>
    tpu.wait_dma2 semaphore(%224 : memref<!tpu.dma_semaphore, #tpu.memory_space<semaphore_mem>>) src(%220 : memref<128xf32, #tpu.memory_space<any>>) dst(%222 : memref<128xf32, #tpu.memory_space<vmem>>)
    %c8_i32_127 = arith.constant 8 : i32
    %c8_i32_128 = arith.constant 8 : i32
    %c0_i32_129 = arith.constant 0 : i32
    %225 = tpu.memref_slice %arg2[%93, %c0_i32_129] : memref<32x128xf32, #tpu.memory_space<any>> -> memref<1x128xf32, #tpu.memory_space<any>>
    %226 = tpu.memref_squeeze %225 : memref<1x128xf32, #tpu.memory_space<any>> -> memref<128xf32, #tpu.memory_space<any>>
    %c0_i32_130 = arith.constant 0 : i32
    %227 = tpu.memref_slice %arg4[%c8_i32_127, %c0_i32_130] : memref<16x128xf32, #tpu.memory_space<vmem>> -> memref<1x128xf32, #tpu.memory_space<vmem>>
    %228 = tpu.memref_squeeze %227 : memref<1x128xf32, #tpu.memory_space<vmem>> -> memref<128xf32, #tpu.memory_space<vmem>>
    %229 = tpu.memref_slice %arg5[%c8_i32_128] : memref<16x!tpu.dma_semaphore, #tpu.memory_space<semaphore_mem>> -> memref<1x!tpu.dma_semaphore, #tpu.memory_space<semaphore_mem>>
    %230 = tpu.memref_squeeze %229 : memref<1x!tpu.dma_semaphore, #tpu.memory_space<semaphore_mem>> -> memref<!tpu.dma_semaphore, #tpu.memory_space<semaphore_mem>>
    tpu.wait_dma2 semaphore(%230 : memref<!tpu.dma_semaphore, #tpu.memory_space<semaphore_mem>>) src(%226 : memref<128xf32, #tpu.memory_space<any>>) dst(%228 : memref<128xf32, #tpu.memory_space<vmem>>)
    %c9_i32_131 = arith.constant 9 : i32
    %c9_i32_132 = arith.constant 9 : i32
    %c0_i32_133 = arith.constant 0 : i32
    %231 = tpu.memref_slice %arg2[%104, %c0_i32_133] : memref<32x128xf32, #tpu.memory_space<any>> -> memref<1x128xf32, #tpu.memory_space<any>>
    %232 = tpu.memref_squeeze %231 : memref<1x128xf32, #tpu.memory_space<any>> -> memref<128xf32, #tpu.memory_space<any>>
    %c0_i32_134 = arith.constant 0 : i32
    %233 = tpu.memref_slice %arg4[%c9_i32_131, %c0_i32_134] : memref<16x128xf32, #tpu.memory_space<vmem>> -> memref<1x128xf32, #tpu.memory_space<vmem>>
    %234 = tpu.memref_squeeze %233 : memref<1x128xf32, #tpu.memory_space<vmem>> -> memref<128xf32, #tpu.memory_space<vmem>>
    %235 = tpu.memref_slice %arg5[%c9_i32_132] : memref<16x!tpu.dma_semaphore, #tpu.memory_space<semaphore_mem>> -> memref<1x!tpu.dma_semaphore, #tpu.memory_space<semaphore_mem>>
    %236 = tpu.memref_squeeze %235 : memref<1x!tpu.dma_semaphore, #tpu.memory_space<semaphore_mem>> -> memref<!tpu.dma_semaphore, #tpu.memory_space<semaphore_mem>>
    tpu.wait_dma2 semaphore(%236 : memref<!tpu.dma_semaphore, #tpu.memory_space<semaphore_mem>>) src(%232 : memref<128xf32, #tpu.memory_space<any>>) dst(%234 : memref<128xf32, #tpu.memory_space<vmem>>)
    %c10_i32_135 = arith.constant 10 : i32
    %c10_i32_136 = arith.constant 10 : i32
    %c0_i32_137 = arith.constant 0 : i32
    %237 = tpu.memref_slice %arg2[%115, %c0_i32_137] : memref<32x128xf32, #tpu.memory_space<any>> -> memref<1x128xf32, #tpu.memory_space<any>>
    %238 = tpu.memref_squeeze %237 : memref<1x128xf32, #tpu.memory_space<any>> -> memref<128xf32, #tpu.memory_space<any>>
    %c0_i32_138 = arith.constant 0 : i32
    %239 = tpu.memref_slice %arg4[%c10_i32_135, %c0_i32_138] : memref<16x128xf32, #tpu.memory_space<vmem>> -> memref<1x128xf32, #tpu.memory_space<vmem>>
    %240 = tpu.memref_squeeze %239 : memref<1x128xf32, #tpu.memory_space<vmem>> -> memref<128xf32, #tpu.memory_space<vmem>>
    %241 = tpu.memref_slice %arg5[%c10_i32_136] : memref<16x!tpu.dma_semaphore, #tpu.memory_space<semaphore_mem>> -> memref<1x!tpu.dma_semaphore, #tpu.memory_space<semaphore_mem>>
    %242 = tpu.memref_squeeze %241 : memref<1x!tpu.dma_semaphore, #tpu.memory_space<semaphore_mem>> -> memref<!tpu.dma_semaphore, #tpu.memory_space<semaphore_mem>>
    tpu.wait_dma2 semaphore(%242 : memref<!tpu.dma_semaphore, #tpu.memory_space<semaphore_mem>>) src(%238 : memref<128xf32, #tpu.memory_space<any>>) dst(%240 : memref<128xf32, #tpu.memory_space<vmem>>)
    %c11_i32_139 = arith.constant 11 : i32
    %c11_i32_140 = arith.constant 11 : i32
    %c0_i32_141 = arith.constant 0 : i32
    %243 = tpu.memref_slice %arg2[%126, %c0_i32_141] : memref<32x128xf32, #tpu.memory_space<any>> -> memref<1x128xf32, #tpu.memory_space<any>>
    %244 = tpu.memref_squeeze %243 : memref<1x128xf32, #tpu.memory_space<any>> -> memref<128xf32, #tpu.memory_space<any>>
    %c0_i32_142 = arith.constant 0 : i32
    %245 = tpu.memref_slice %arg4[%c11_i32_139, %c0_i32_142] : memref<16x128xf32, #tpu.memory_space<vmem>> -> memref<1x128xf32, #tpu.memory_space<vmem>>
    %246 = tpu.memref_squeeze %245 : memref<1x128xf32, #tpu.memory_space<vmem>> -> memref<128xf32, #tpu.memory_space<vmem>>
    %247 = tpu.memref_slice %arg5[%c11_i32_140] : memref<16x!tpu.dma_semaphore, #tpu.memory_space<semaphore_mem>> -> memref<1x!tpu.dma_semaphore, #tpu.memory_space<semaphore_mem>>
    %248 = tpu.memref_squeeze %247 : memref<1x!tpu.dma_semaphore, #tpu.memory_space<semaphore_mem>> -> memref<!tpu.dma_semaphore, #tpu.memory_space<semaphore_mem>>
    tpu.wait_dma2 semaphore(%248 : memref<!tpu.dma_semaphore, #tpu.memory_space<semaphore_mem>>) src(%244 : memref<128xf32, #tpu.memory_space<any>>) dst(%246 : memref<128xf32, #tpu.memory_space<vmem>>)
    %c12_i32_143 = arith.constant 12 : i32
    %c12_i32_144 = arith.constant 12 : i32
    %c0_i32_145 = arith.constant 0 : i32
    %249 = tpu.memref_slice %arg2[%137, %c0_i32_145] : memref<32x128xf32, #tpu.memory_space<any>> -> memref<1x128xf32, #tpu.memory_space<any>>
    %250 = tpu.memref_squeeze %249 : memref<1x128xf32, #tpu.memory_space<any>> -> memref<128xf32, #tpu.memory_space<any>>
    %c0_i32_146 = arith.constant 0 : i32
    %251 = tpu.memref_slice %arg4[%c12_i32_143, %c0_i32_146] : memref<16x128xf32, #tpu.memory_space<vmem>> -> memref<1x128xf32, #tpu.memory_space<vmem>>
    %252 = tpu.memref_squeeze %251 : memref<1x128xf32, #tpu.memory_space<vmem>> -> memref<128xf32, #tpu.memory_space<vmem>>
    %253 = tpu.memref_slice %arg5[%c12_i32_144] : memref<16x!tpu.dma_semaphore, #tpu.memory_space<semaphore_mem>> -> memref<1x!tpu.dma_semaphore, #tpu.memory_space<semaphore_mem>>
    %254 = tpu.memref_squeeze %253 : memref<1x!tpu.dma_semaphore, #tpu.memory_space<semaphore_mem>> -> memref<!tpu.dma_semaphore, #tpu.memory_space<semaphore_mem>>
    tpu.wait_dma2 semaphore(%254 : memref<!tpu.dma_semaphore, #tpu.memory_space<semaphore_mem>>) src(%250 : memref<128xf32, #tpu.memory_space<any>>) dst(%252 : memref<128xf32, #tpu.memory_space<vmem>>)
    %c13_i32_147 = arith.constant 13 : i32
    %c13_i32_148 = arith.constant 13 : i32
    %c0_i32_149 = arith.constant 0 : i32
    %255 = tpu.memref_slice %arg2[%148, %c0_i32_149] : memref<32x128xf32, #tpu.memory_space<any>> -> memref<1x128xf32, #tpu.memory_space<any>>
    %256 = tpu.memref_squeeze %255 : memref<1x128xf32, #tpu.memory_space<any>> -> memref<128xf32, #tpu.memory_space<any>>
    %c0_i32_150 = arith.constant 0 : i32
    %257 = tpu.memref_slice %arg4[%c13_i32_147, %c0_i32_150] : memref<16x128xf32, #tpu.memory_space<vmem>> -> memref<1x128xf32, #tpu.memory_space<vmem>>
    %258 = tpu.memref_squeeze %257 : memref<1x128xf32, #tpu.memory_space<vmem>> -> memref<128xf32, #tpu.memory_space<vmem>>
    %259 = tpu.memref_slice %arg5[%c13_i32_148] : memref<16x!tpu.dma_semaphore, #tpu.memory_space<semaphore_mem>> -> memref<1x!tpu.dma_semaphore, #tpu.memory_space<semaphore_mem>>
    %260 = tpu.memref_squeeze %259 : memref<1x!tpu.dma_semaphore, #tpu.memory_space<semaphore_mem>> -> memref<!tpu.dma_semaphore, #tpu.memory_space<semaphore_mem>>
    tpu.wait_dma2 semaphore(%260 : memref<!tpu.dma_semaphore, #tpu.memory_space<semaphore_mem>>) src(%256 : memref<128xf32, #tpu.memory_space<any>>) dst(%258 : memref<128xf32, #tpu.memory_space<vmem>>)
    %c14_i32_151 = arith.constant 14 : i32
    %c14_i32_152 = arith.constant 14 : i32
    %c0_i32_153 = arith.constant 0 : i32
    %261 = tpu.memref_slice %arg2[%159, %c0_i32_153] : memref<32x128xf32, #tpu.memory_space<any>> -> memref<1x128xf32, #tpu.memory_space<any>>
    %262 = tpu.memref_squeeze %261 : memref<1x128xf32, #tpu.memory_space<any>> -> memref<128xf32, #tpu.memory_space<any>>
    %c0_i32_154 = arith.constant 0 : i32
    %263 = tpu.memref_slice %arg4[%c14_i32_151, %c0_i32_154] : memref<16x128xf32, #tpu.memory_space<vmem>> -> memref<1x128xf32, #tpu.memory_space<vmem>>
    %264 = tpu.memref_squeeze %263 : memref<1x128xf32, #tpu.memory_space<vmem>> -> memref<128xf32, #tpu.memory_space<vmem>>
    %265 = tpu.memref_slice %arg5[%c14_i32_152] : memref<16x!tpu.dma_semaphore, #tpu.memory_space<semaphore_mem>> -> memref<1x!tpu.dma_semaphore, #tpu.memory_space<semaphore_mem>>
    %266 = tpu.memref_squeeze %265 : memref<1x!tpu.dma_semaphore, #tpu.memory_space<semaphore_mem>> -> memref<!tpu.dma_semaphore, #tpu.memory_space<semaphore_mem>>
    tpu.wait_dma2 semaphore(%266 : memref<!tpu.dma_semaphore, #tpu.memory_space<semaphore_mem>>) src(%262 : memref<128xf32, #tpu.memory_space<any>>) dst(%264 : memref<128xf32, #tpu.memory_space<vmem>>)
    %c15_i32_155 = arith.constant 15 : i32
    %c15_i32_156 = arith.constant 15 : i32
    %c0_i32_157 = arith.constant 0 : i32
    %267 = tpu.memref_slice %arg2[%170, %c0_i32_157] : memref<32x128xf32, #tpu.memory_space<any>> -> memref<1x128xf32, #tpu.memory_space<any>>
    %268 = tpu.memref_squeeze %267 : memref<1x128xf32, #tpu.memory_space<any>> -> memref<128xf32, #tpu.memory_space<any>>
    %c0_i32_158 = arith.constant 0 : i32
    %269 = tpu.memref_slice %arg4[%c15_i32_155, %c0_i32_158] : memref<16x128xf32, #tpu.memory_space<vmem>> -> memref<1x128xf32, #tpu.memory_space<vmem>>
    %270 = tpu.memref_squeeze %269 : memref<1x128xf32, #tpu.memory_space<vmem>> -> memref<128xf32, #tpu.memory_space<vmem>>
    %271 = tpu.memref_slice %arg5[%c15_i32_156] : memref<16x!tpu.dma_semaphore, #tpu.memory_space<semaphore_mem>> -> memref<1x!tpu.dma_semaphore, #tpu.memory_space<semaphore_mem>>
    %272 = tpu.memref_squeeze %271 : memref<1x!tpu.dma_semaphore, #tpu.memory_space<semaphore_mem>> -> memref<!tpu.dma_semaphore, #tpu.memory_space<semaphore_mem>>
    tpu.wait_dma2 semaphore(%272 : memref<!tpu.dma_semaphore, #tpu.memory_space<semaphore_mem>>) src(%268 : memref<128xf32, #tpu.memory_space<any>>) dst(%270 : memref<128xf32, #tpu.memory_space<vmem>>)
    %c0 = arith.constant 0 : index
    %c0_159 = arith.constant 0 : index
    %273 = vector.load %arg4[%c0, %c0_159] : memref<16x128xf32, #tpu.memory_space<vmem>>, vector<16x128xf32>
    %c0_160 = arith.constant 0 : index
    %c0_161 = arith.constant 0 : index
    %274 = vector.load %arg3[%c0_160, %c0_161] : memref<16x128xf32, #tpu.memory_space<vmem>>, vector<16x128xf32>
    tpu.vector_store %arg3[%c0_160, %c0_161], %273 {strides = array<i32>} : memref<16x128xf32, #tpu.memory_space<vmem>>, vector<16x128xf32>,
    return
  }
  func.func @transform_1(%arg0: i32, %arg1: memref<16xi32, #tpu.memory_space<smem>>) -> (i32, i32) {
    %c0_i32 = arith.constant 0 : i32
    %c0_i32_0 = arith.constant 0 : i32
    return %arg0, %c0_i32 : i32, i32
  }
}

</mosaic_0001>

<bundles_post_ra>
// kernel: tpu_custom_call.1
= control target key start
LH: loop header
LB: loop body
LE: loop exit
PB: predicated region body
PF: predicated region fallthrough
CT: control target
= control target key end

     0   :  { %s1166_s12 = smov [#allocation5]   ;;  %s1465_s0 = inlined_call_operand.hbm [shape: s32[16], index: 0, kind: input, shape index: {}]   ;;  %s1466_s1 = inlined_call_operand.hbm [shape: f32[32,128], index: 1, kind: input, shape index: {}]   ;;  %s1467_s2 = inlined_call_operand.hbm [shape: f32[16,128], index: 2, kind: output, shape index: {}]  }
   0x1   :  { %s8_s11 = sshll.u32 %s1465_s0, 4  ;;  %s9_s11 = int_to_ptr.hbm [resolvable:$true] %s8_s11 }
   0x2   :  { %11 = dma.hbm_to_smem %s9_s11, 16, %s1166_s12, [#allocation4] }
   0x3   :  { %1130 = dma.done.wait [#allocation4], 16 }
   0x4   :  { %1131 = vsyncadd [#allocation4], 4294967280 }
   0x5   :  { %14 = sfence }
   0x6   :  { %15 = vsyncpa [#allocation7], 0  ;;  %s17_s13 = sld [smem:[#allocation5]]  ;;  %s1167_s14 = smov [#allocation2]  }
   0x7   :  { %s1204_s15 = sshll.u32 %s1167_s14, 4  ;;  %s552_s16 = sld [smem:[#allocation5 + $0x1]]  ;;  %s33_s15 = int_to_ptr.vmem [resolvable:$true] %s1204_s15 }
   0x8   :  { %s1168_s17 = smov [#allocation2 + $0x1]   ;;  %s1209_s19 = sld [smem:[#allocation5 + $0x2]] }
   0x9   :  { %s1207_s18 = sshll.u32 %s1168_s17, 4  ;;  %s1169_s0 = smov [#allocation2 + $0x2]   ;;  %s55_s18 = int_to_ptr.vmem [resolvable:$true] %s1207_s18 }
   0xa   :  { %s1212_s20 = sshll.u32 %s1169_s0, 4  ;;  %s1214_s21 = sld [smem:[#allocation5 + $0x3]]  ;;  %s77_s20 = int_to_ptr.vmem [resolvable:$true] %s1212_s20 }
   0xb   :  { %s1226_s6 = scalar_lea.hbm %s1466_s1, 32 }
   0xc   :  { %p18_p0 = scmp.gt.s32.totalorder %s17_s13, 0  ;;  %p547_p1 = scmp.lt.s32.totalorder %s17_s13, 31 }
   0xd   :  { %p38_p2 = scmp.gt.s32.totalorder %s552_s16, 0  ;;  %p553_p3 = scmp.lt.s32.totalorder %s552_s16, 31 }
   0xe   :  { %s1469_s13 = smov (!%p18_p0, %s17_s13), 0  ;;  %p60_p4 = scmp.gt.s32.totalorder %s1209_s19, 0 }
   0xf   :  { %s1471_s16 = smov (!%p38_p2, %s552_s16), 0  ;;  %s1473_s13 = smov (!%p547_p1, %s1469_s13), 31 }
  0x10   :  { %s1475_s16 = smov (!%p553_p3, %s1471_s16), 31  ;;  %s22_s24 = scalar_lea.hbm %s1466_s1, %s1473_s13 }
  0x11   :  { %s30_s25 = sshll.u32 %s22_s24, 4  ;;  %s42_s28 = scalar_lea.hbm %s1466_s1, %s1475_s16  ;;  %s31_s25 = int_to_ptr.hbm [resolvable:$true] %s30_s25 }
  0x12   :  { %s52_s29 = sshll.u32 %s42_s28, 4  ;;  %s722_s30 = sshra.s32 %s31_s25, 4  ;;  %s723_s30 = int_to_ptr.hbm [resolvable:$true] %s722_s30  ;;  %s53_s29 = int_to_ptr.hbm [resolvable:$true] %s52_s29 }
  0x13   :  { %s724_s3 = scalar_lea.hbm %s723_s30, 1  ;;  %p727_p6 = scmp.lt.s32.totalorder %s723_s30, %s1466_s1 }
  0x14   :  { %p725_p5 = scmp.ne.s32.totalorder %s723_s30, %s724_s3  ;;  %p728_p7 = scmp.lt.s32.totalorder %s1226_s6, %s724_s3 }
  0x16   :  { %p729_p8 = por %p728_p7, %p727_p6 }
  0x18   :  { %p730_p9 = pnand %p729_p8, %p725_p5 }
  0x1a   :  { %733 = shalt.err (!%p730_p9)  }
  0x1b   :  { %35 = dma.hbm_to_vmem [thread:$0]  %s31_s25, 16, %s33_s15, [#allocation3] }
  0x1c   :  { %p559_p10 = scmp.lt.s32.totalorder %s1209_s19, 31  ;;  %s746_s9 = sshra.s32 %s53_s29, 4  ;;  %s747_s9 = int_to_ptr.hbm [resolvable:$true] %s746_s9 }
  0x1d   :  { %s748_s10 = scalar_lea.hbm %s747_s9, 1  ;;  %p751_p12 = scmp.lt.s32.totalorder %s747_s9, %s1466_s1 }
  0x1e   :  { %p749_p11 = scmp.ne.s32.totalorder %s747_s9, %s748_s10  ;;  %p752_p13 = scmp.lt.s32.totalorder %s1226_s6, %s748_s10 }
  0x20   :  { %p753_p0 = por %p752_p13, %p751_p12 }
  0x22   :  { %p754_p1 = pnand %p753_p0, %p749_p11 }
  0x24   :  { %757 = shalt.err (!%p754_p1)  }
  0x25   :  { %57 = dma.hbm_to_vmem [thread:$0]  %s53_s29, 16, %s55_s18, [#allocation3 + $0x1] }
  0x26   :  { %s61_s13 = scalar_select %p60_p4, %s1209_s19, 0 }
  0x27   :  { %p82_p2 = scmp.gt.s32.totalorder %s1214_s21, 0  ;;  %p565_p3 = scmp.lt.s32.totalorder %s1214_s21, 31 }
  0x28   :  { %s1477_s13 = smov (!%p559_p10, %s61_s13), 31  ;;  %s1170_s22 = smov [#allocation2 + $0x3]  }
  0x29   :  { %s83_s14 = scalar_select %p82_p2, %s1214_s21, 0 }
  0x2a   :  { %s64_s17 = scalar_lea.hbm %s1466_s1, %s1477_s13  ;;  %s1253_s23 = sshll.u32 %s1170_s22, 4  ;;  %s99_s23 = int_to_ptr.vmem [resolvable:$true] %s1253_s23 }
  0x2b   :  { %s74_s0 = sshll.u32 %s64_s17, 4  ;;  %s75_s0 = int_to_ptr.hbm [resolvable:$true] %s74_s0 }
  0x2c   :  { %s770_s24 = sshra.s32 %s75_s0, 4  ;;  %s771_s24 = int_to_ptr.hbm [resolvable:$true] %s770_s24 }
  0x2d   :  { %s772_s18 = scalar_lea.hbm %s771_s24, 1  ;;  %p775_p5 = scmp.lt.s32.totalorder %s771_s24, %s1466_s1 }
  0x2e   :  { %p773_p4 = scmp.ne.s32.totalorder %s771_s24, %s772_s18  ;;  %p776_p6 = scmp.lt.s32.totalorder %s1226_s6, %s772_s18 }
  0x30   :  { %p777_p7 = por %p776_p6, %p775_p5 }
  0x32   :  { %p778_p8 = pnand %p777_p7, %p773_p4 }
  0x34   :  { %781 = shalt.err (!%p778_p8)  }
  0x35   :  { %79 = dma.hbm_to_vmem [thread:$0]  %s75_s0, 16, %s77_s20, [#allocation3 + $0x2] }
  0x36   :  { %s1479_s14 = smov (!%p565_p3, %s83_s14), 31  ;;  %s570_s19 = sld [smem:[#allocation5 + $0x4]] }
  0x37   :  { %s86_s29 = scalar_lea.hbm %s1466_s1, %s1479_s14  ;;  %s1171_s3 = smov [#allocation2 + $0x4]  }
  0x38   :  { %s96_s30 = sshll.u32 %s86_s29, 4  ;;  %s1265_s4 = sshll.u32 %s1171_s3, 4  ;;  %s97_s30 = int_to_ptr.hbm [resolvable:$true] %s96_s30  ;;  %s121_s4 = int_to_ptr.vmem [resolvable:$true] %s1265_s4 }
  0x39   :  { %s794_s5 = sshra.s32 %s97_s30, 4  ;;  %s795_s5 = int_to_ptr.hbm [resolvable:$true] %s794_s5 }
  0x3a   :  { %s796_s20 = scalar_lea.hbm %s795_s5, 1  ;;  %p799_p10 = scmp.lt.s32.totalorder %s795_s5, %s1466_s1 }
  0x3b   :  { %p797_p9 = scmp.ne.s32.totalorder %s795_s5, %s796_s20  ;;  %p800_p11 = scmp.lt.s32.totalorder %s1226_s6, %s796_s20 }
  0x3d   :  { %p801_p12 = por %p800_p11, %p799_p10 }
  0x3f   :  { %p802_p13 = pnand %p801_p12, %p797_p9 }
  0x41   :  { %805 = shalt.err (!%p802_p13)  }
  0x42   :  { %101 = dma.hbm_to_vmem [thread:$0]  %s97_s30, 16, %s99_s23, [#allocation3 + $0x3] }
  0x43   :  { %s1272_s8 = sld [smem:[#allocation5 + $0x5]]  ;;  %p104_p0 = scmp.gt.s32.totalorder %s570_s19, 0 }
  0x44   :  { %p571_p1 = scmp.lt.s32.totalorder %s570_s19, 31  ;;  %s1172_s9 = smov [#allocation2 + $0x5]  }
  0x45   :  { %s1274_s10 = sshll.u32 %s1172_s9, 4  ;;  %s582_s11 = sld [smem:[#allocation5 + $0x6]]  ;;  %s143_s10 = int_to_ptr.vmem [resolvable:$true] %s1274_s10 }
  0x46   :  { %s1481_s19 = smov (!%p104_p0, %s570_s19), 0  ;;  %s1173_s15 = smov [#allocation2 + $0x6]  }
  0x47   :  { %s1483_s19 = smov (!%p571_p1, %s1481_s19), 31  ;;  %s1282_s16 = sshll.u32 %s1173_s15, 4  ;;  %s165_s16 = int_to_ptr.vmem [resolvable:$true] %s1282_s16 }
  0x48   :  { %s108_s14 = scalar_lea.hbm %s1466_s1, %s1483_s19 }
  0x49   :  { %p126_p2 = scmp.gt.s32.totalorder %s1272_s8, 0  ;;  %p577_p3 = scmp.lt.s32.totalorder %s1272_s8, 31 }
  0x4a   :  { %s118_s17 = sshll.u32 %s108_s14, 4  ;;  %s119_s17 = int_to_ptr.hbm [resolvable:$true] %s118_s17 }
  0x4b   :  { %p148_p4 = scmp.gt.s32.totalorder %s582_s11, 0  ;;  %p583_p5 = scmp.lt.s32.totalorder %s582_s11, 31 }
  0x4c   :  { %s818_s0 = sshra.s32 %s119_s17, 4  ;;  %s819_s0 = int_to_ptr.hbm [resolvable:$true] %s818_s0 }
  0x4d   :  { %s820_s22 = scalar_lea.hbm %s819_s0, 1  ;;  %p823_p7 = scmp.lt.s32.totalorder %s819_s0, %s1466_s1 }
  0x4e   :  { %p821_p6 = scmp.ne.s32.totalorder %s819_s0, %s820_s22  ;;  %p824_p8 = scmp.lt.s32.totalorder %s1226_s6, %s820_s22 }
  0x50   :  { %p825_p9 = por %p824_p8, %p823_p7 }
  0x52   :  { %p826_p10 = pnand %p825_p9, %p821_p6 }
  0x54   :  { %829 = shalt.err (!%p826_p10)  }
  0x55   :  { %123 = dma.hbm_to_vmem [thread:$0]  %s119_s17, 16, %s121_s4, [#allocation3 + $0x4] }
  0x56   :  { %s127_s18 = scalar_select %p126_p2, %s1272_s8, 0 }
  0x57   :  { %s149_s25 = scalar_select %p148_p4, %s582_s11, 0 }
  0x58   :  { %s1485_s18 = smov (!%p577_p3, %s127_s18), 31 }
  0x59   :  { %s1487_s25 = smov (!%p583_p5, %s149_s25), 31  ;;  %s130_s27 = scalar_lea.hbm %s1466_s1, %s1485_s18 }
  0x5a   :  { %s140_s28 = sshll.u32 %s130_s27, 4  ;;  %s152_s3 = scalar_lea.hbm %s1466_s1, %s1487_s25  ;;  %s141_s28 = int_to_ptr.hbm [resolvable:$true] %s140_s28 }
  0x5b   :  { %s162_s4 = sshll.u32 %s152_s3, 4  ;;  %s842_s5 = sshra.s32 %s141_s28, 4  ;;  %s843_s5 = int_to_ptr.hbm [resolvable:$true] %s842_s5  ;;  %s163_s4 = int_to_ptr.hbm [resolvable:$true] %s162_s4 }
  0x5c   :  { %s844_s20 = scalar_lea.hbm %s843_s5, 1  ;;  %p847_p12 = scmp.lt.s32.totalorder %s843_s5, %s1466_s1 }
  0x5d   :  { %p845_p11 = scmp.ne.s32.totalorder %s843_s5, %s844_s20  ;;  %p848_p13 = scmp.lt.s32.totalorder %s1226_s6, %s844_s20 }
  0x5f   :  { %p849_p0 = por %p848_p13, %p847_p12 }
  0x61   :  { %p850_p1 = pnand %p849_p0, %p845_p11 }
  0x63   :  { %853 = shalt.err (!%p850_p1)  }
  0x64   :  { %145 = dma.hbm_to_vmem [thread:$0]  %s141_s28, 16, %s143_s10, [#allocation3 + $0x5] }
  0x65   :  { %s588_s8 = sld [smem:[#allocation5 + $0x7]]  ;;  %s866_s9 = sshra.s32 %s163_s4, 4  ;;  %s867_s9 = int_to_ptr.hbm [resolvable:$true] %s866_s9 }
  0x66   :  { %s868_s11 = scalar_lea.hbm %s867_s9, 1  ;;  %p871_p3 = scmp.lt.s32.totalorder %s867_s9, %s1466_s1 }
  0x67   :  { %p869_p2 = scmp.ne.s32.totalorder %s867_s9, %s868_s11  ;;  %p872_p4 = scmp.lt.s32.totalorder %s1226_s6, %s868_s11 }
  0x69   :  { %p873_p5 = por %p872_p4, %p871_p3 }
  0x6b   :  { %p874_p6 = pnand %p873_p5, %p869_p2 }
  0x6d   :  { %877 = shalt.err (!%p874_p6)  }
  0x6e   :  { %167 = dma.hbm_to_vmem [thread:$0]  %s163_s4, 16, %s165_s16, [#allocation3 + $0x6] }
  0x6f   :  { %s1314_s14 = sld [smem:[#allocation5 + $0x8]]  ;;  %s1174_s10 = smov [#allocation2 + $0x7]  }
  0x70   :  { %s1316_s15 = sshll.u32 %s1174_s10, 4  ;;  %s1175_s17 = smov [#allocation2 + $0x8]   ;;  %s187_s15 = int_to_ptr.vmem [resolvable:$true] %s1316_s15 }
  0x71   :  { %s1319_s0 = sshll.u32 %s1175_s17, 4  ;;  %s1322_s22 = sld [smem:[#allocation5 + $0x9]]  ;;  %s209_s0 = int_to_ptr.vmem [resolvable:$true] %s1319_s0 }
  0x72   :  { %p170_p7 = scmp.gt.s32.totalorder %s588_s8, 0  ;;  %p589_p8 = scmp.lt.s32.totalorder %s588_s8, 31 }
  0x73   :  { %s1324_s16 = sld [smem:[#allocation5 + $0xa]]  ;;  %s1176_s19 = smov [#allocation2 + $0x9]  }
  0x74   :  { %s1489_s8 = smov (!%p170_p7, %s588_s8), 0  ;;  %s1334_s27 = sshll.u32 %s1176_s19, 4  ;;  %s231_s27 = int_to_ptr.vmem [resolvable:$true] %s1334_s27 }
  0x75   :  { %p192_p9 = scmp.gt.s32.totalorder %s1314_s14, 0  ;;  %p595_p10 = scmp.lt.s32.totalorder %s1314_s14, 31 }
  0x76   :  { %s1491_s8 = smov (!%p589_p8, %s1489_s8), 31 }
  0x77   :  { %s193_s23 = scalar_select %p192_p9, %s1314_s14, 0 }
  0x78   :  { %s174_s25 = scalar_lea.hbm %s1466_s1, %s1491_s8  ;;  %p214_p11 = scmp.gt.s32.totalorder %s1322_s22, 0 }
  0x79   :  { %s184_s26 = sshll.u32 %s174_s25, 4  ;;  %p601_p12 = scmp.lt.s32.totalorder %s1322_s22, 31  ;;  %s185_s26 = int_to_ptr.hbm [resolvable:$true] %s184_s26 }
  0x7a   :  { %s890_s28 = sshra.s32 %s185_s26, 4  ;;  %s891_s28 = int_to_ptr.hbm [resolvable:$true] %s890_s28 }
  0x7b   :  { %s892_s29 = scalar_lea.hbm %s891_s28, 1  ;;  %p895_p0 = scmp.lt.s32.totalorder %s891_s28, %s1466_s1 }
  0x7c   :  { %p893_p13 = scmp.ne.s32.totalorder %s891_s28, %s892_s29  ;;  %p896_p1 = scmp.lt.s32.totalorder %s1226_s6, %s892_s29 }
  0x7e   :  { %p897_p2 = por %p896_p1, %p895_p0 }
  0x80   :  { %p898_p3 = pnand %p897_p2, %p893_p13 }
  0x82   :  { %901 = shalt.err (!%p898_p3)  }
  0x83   :  { %189 = dma.hbm_to_vmem [thread:$0]  %s185_s26, 16, %s187_s15, [#allocation3 + $0x7] }
  0x84   :  { %s1493_s23 = smov (!%p595_p10, %s193_s23), 31  ;;  %p236_p4 = scmp.gt.s32.totalorder %s1324_s16, 0 }
  0x85   :  { %s215_s4 = scalar_select %p214_p11, %s1322_s22, 0 }
  0x86   :  { %s196_s21 = scalar_lea.hbm %s1466_s1, %s1493_s23  ;;  %p607_p5 = scmp.lt.s32.totalorder %s1324_s16, 31 }
  0x87   :  { %s206_s7 = sshll.u32 %s196_s21, 4  ;;  %s207_s7 = int_to_ptr.hbm [resolvable:$true] %s206_s7 }
  0x88   :  { %s914_s8 = sshra.s32 %s207_s7, 4  ;;  %s915_s8 = int_to_ptr.hbm [resolvable:$true] %s914_s8 }
  0x89   :  { %s916_s9 = scalar_lea.hbm %s915_s8, 1  ;;  %p919_p7 = scmp.lt.s32.totalorder %s915_s8, %s1466_s1 }
  0x8a   :  { %p917_p6 = scmp.ne.s32.totalorder %s915_s8, %s916_s9  ;;  %p920_p8 = scmp.lt.s32.totalorder %s1226_s6, %s916_s9 }
  0x8c   :  { %p921_p9 = por %p920_p8, %p919_p7 }
  0x8e   :  { %p922_p10 = pnand %p921_p9, %p917_p6 }
  0x90   :  { %925 = shalt.err (!%p922_p10)  }
  0x91   :  { %211 = dma.hbm_to_vmem [thread:$0]  %s207_s7, 16, %s209_s0, [#allocation3 + $0x8] }
  0x92   :  { %s1495_s4 = smov (!%p601_p12, %s215_s4), 31  ;;  %s1177_s23 = smov [#allocation2 + $0xa]  }
  0x93   :  { %s237_s13 = scalar_select %p236_p4, %s1324_s16, 0 }
  0x94   :  { %s218_s15 = scalar_lea.hbm %s1466_s1, %s1495_s4  ;;  %s1367_s24 = sshll.u32 %s1177_s23, 4  ;;  %s253_s24 = int_to_ptr.vmem [resolvable:$true] %s1367_s24 }
  0x95   :  { %s228_s17 = sshll.u32 %s218_s15, 4  ;;  %s229_s17 = int_to_ptr.hbm [resolvable:$true] %s228_s17 }
  0x96   :  { %s938_s18 = sshra.s32 %s229_s17, 4  ;;  %s939_s18 = int_to_ptr.hbm [resolvable:$true] %s938_s18 }
  0x97   :  { %s940_s25 = scalar_lea.hbm %s939_s18, 1  ;;  %p943_p13 = scmp.lt.s32.totalorder %s939_s18, %s1466_s1 }
  0x98   :  { %p941_p11 = scmp.ne.s32.totalorder %s939_s18, %s940_s25  ;;  %p944_p12 = scmp.lt.s32.totalorder %s1226_s6, %s940_s25 }
  0x9a   :  { %p945_p0 = por %p944_p12, %p943_p13 }
  0x9c   :  { %p946_p1 = pnand %p945_p0, %p941_p11 }
  0x9e   :  { %949 = shalt.err (!%p946_p1)  }
  0x9f   :  { %233 = dma.hbm_to_vmem [thread:$0]  %s229_s17, 16, %s231_s27, [#allocation3 + $0x9] }
  0xa0   :  { %s1497_s13 = smov (!%p607_p5, %s237_s13), 31  ;;  %s612_s0 = sld [smem:[#allocation5 + $0xb]] }
  0xa1   :  { %s240_s29 = scalar_lea.hbm %s1466_s1, %s1497_s13  ;;  %s1178_s3 = smov [#allocation2 + $0xb]  }
  0xa2   :  { %s250_s30 = sshll.u32 %s240_s29, 4  ;;  %s1381_s4 = sshll.u32 %s1178_s3, 4  ;;  %s251_s30 = int_to_ptr.hbm [resolvable:$true] %s250_s30  ;;  %s275_s4 = int_to_ptr.vmem [resolvable:$true] %s1381_s4 }
  0xa3   :  { %s1383_s5 = sld [smem:[#allocation5 + $0xc]]  ;;  %s962_s20 = sshra.s32 %s251_s30, 4  ;;  %s963_s20 = int_to_ptr.hbm [resolvable:$true] %s962_s20 }
  0xa4   :  { %s964_s21 = scalar_lea.hbm %s963_s20, 1  ;;  %p967_p3 = scmp.lt.s32.totalorder %s963_s20, %s1466_s1 }
  0xa5   :  { %p965_p2 = scmp.ne.s32.totalorder %s963_s20, %s964_s21  ;;  %p968_p4 = scmp.lt.s32.totalorder %s1226_s6, %s964_s21 }
  0xa7   :  { %p969_p5 = por %p968_p4, %p967_p3 }
  0xa9   :  { %p970_p6 = pnand %p969_p5, %p965_p2 }
  0xab   :  { %973 = shalt.err (!%p970_p6)  }
  0xac   :  { %255 = dma.hbm_to_vmem [thread:$0]  %s251_s30, 16, %s253_s24, [#allocation3 + $0xa] }
  0xad   :  { %s1389_s7 = sld [smem:[#allocation5 + $0xd]]  ;;  %p258_p7 = scmp.gt.s32.totalorder %s612_s0, 0 }
  0xae   :  { %p613_p8 = scmp.lt.s32.totalorder %s612_s0, 31  ;;  %s1179_s8 = smov [#allocation2 + $0xc]  }
  0xaf   :  { %s1392_s9 = sshll.u32 %s1179_s8, 4  ;;  %s1499_s0 = smov (!%p258_p7, %s612_s0), 0  ;;  %s297_s9 = int_to_ptr.vmem [resolvable:$true] %s1392_s9 }
  0xb0   :  { %p280_p9 = scmp.gt.s32.totalorder %s1383_s5, 0  ;;  %s1501_s0 = smov (!%p613_p8, %s1499_s0), 31 }
  0xb1   :  { %s262_s14 = scalar_lea.hbm %s1466_s1, %s1501_s0  ;;  %p619_p10 = scmp.lt.s32.totalorder %s1383_s5, 31 }
  0xb2   :  { %s281_s11 = scalar_select %p280_p9, %s1383_s5, 0 }
  0xb3   :  { %s272_s10 = sshll.u32 %s262_s14, 4  ;;  %p302_p11 = scmp.gt.s32.totalorder %s1389_s7, 0  ;;  %s273_s10 = int_to_ptr.hbm [resolvable:$true] %s272_s10 }
  0xb4   :  { %s986_s15 = sshra.s32 %s273_s10, 4  ;;  %s987_s15 = int_to_ptr.hbm [resolvable:$true] %s986_s15 }
  0xb5   :  { %s988_s17 = scalar_lea.hbm %s987_s15, 1  ;;  %p991_p12 = scmp.lt.s32.totalorder %s987_s15, %s1466_s1 }
  0xb6   :  { %p989_p13 = scmp.ne.s32.totalorder %s987_s15, %s988_s17  ;;  %p992_p0 = scmp.lt.s32.totalorder %s1226_s6, %s988_s17 }
  0xb8   :  { %p993_p1 = por %p992_p0, %p991_p12 }
  0xba   :  { %p994_p2 = pnand %p993_p1, %p989_p13 }
  0xbc   :  { %997 = shalt.err (!%p994_p2)  }
  0xbd   :  { %277 = dma.hbm_to_vmem [thread:$0]  %s273_s10, 16, %s275_s4, [#allocation3 + $0xb] }
  0xbe   :  { %s1503_s11 = smov (!%p619_p10, %s281_s11), 31  ;;  %p625_p3 = scmp.lt.s32.totalorder %s1389_s7, 31 }
  0xbf   :  { %s303_s18 = scalar_select %p302_p11, %s1389_s7, 0 }
  0xc0   :  { %s284_s19 = scalar_lea.hbm %s1466_s1, %s1503_s11  ;;  %s1180_s22 = smov [#allocation2 + $0xd]  }
  0xc1   :  { %s294_s0 = sshll.u32 %s284_s19, 4  ;;  %s1415_s28 = sshll.u32 %s1180_s22, 4  ;;  %s295_s0 = int_to_ptr.hbm [resolvable:$true] %s294_s0  ;;  %s319_s28 = int_to_ptr.vmem [resolvable:$true] %s1415_s28 }
  0xc2   :  { %s1417_s29 = sld [smem:[#allocation5 + $0xe]]  ;;  %s1010_s30 = sshra.s32 %s295_s0, 4  ;;  %s1011_s30 = int_to_ptr.hbm [resolvable:$true] %s1010_s30 }
  0xc3   :  { %s1012_s3 = scalar_lea.hbm %s1011_s30, 1  ;;  %p1015_p5 = scmp.lt.s32.totalorder %s1011_s30, %s1466_s1 }
  0xc4   :  { %p1013_p4 = scmp.ne.s32.totalorder %s1011_s30, %s1012_s3  ;;  %p1016_p6 = scmp.lt.s32.totalorder %s1226_s6, %s1012_s3 }
  0xc6   :  { %p1017_p7 = por %p1016_p6, %p1015_p5 }
  0xc8   :  { %p1018_p8 = pnand %p1017_p7, %p1013_p4 }
  0xca   :  { %1021 = shalt.err (!%p1018_p8)  }
  0xcb   :  { %299 = dma.hbm_to_vmem [thread:$0]  %s295_s0, 16, %s297_s9, [#allocation3 + $0xc] }
  0xcc   :  { %s1505_s18 = smov (!%p625_p3, %s303_s18), 31  ;;  %s1427_s20 = sld [smem:[#allocation5 + $0xf]] }
  0xcd   :  { %s306_s16 = scalar_lea.hbm %s1466_s1, %s1505_s18  ;;  %s1181_s11 = smov [#allocation2 + $0xe]  }
  0xce   :  { %s316_s8 = sshll.u32 %s306_s16, 4  ;;  %s1433_s12 = sshll.u32 %s1181_s11, 4  ;;  %s317_s8 = int_to_ptr.hbm [resolvable:$true] %s316_s8  ;;  %s341_s12 = int_to_ptr.vmem [resolvable:$true] %s1433_s12 }
  0xcf   :  { %p324_p9 = scmp.gt.s32.totalorder %s1417_s29, 0  ;;  %s1034_s13 = sshra.s32 %s317_s8, 4  ;;  %s1035_s13 = int_to_ptr.hbm [resolvable:$true] %s1034_s13 }
  0xd0   :  { %s1036_s14 = scalar_lea.hbm %s1035_s13, 1  ;;  %p1039_p11 = scmp.lt.s32.totalorder %s1035_s13, %s1466_s1 }
  0xd1   :  { %p1037_p10 = scmp.ne.s32.totalorder %s1035_s13, %s1036_s14  ;;  %p1040_p13 = scmp.lt.s32.totalorder %s1226_s6, %s1036_s14 }
  0xd3   :  { %p1041_p12 = por %p1040_p13, %p1039_p11 }
  0xd5   :  { %p1042_p0 = pnand %p1041_p12, %p1037_p10 }
  0xd7   :  { %1045 = shalt.err (!%p1042_p0)  }
  0xd8   :  { %321 = dma.hbm_to_vmem [thread:$0]  %s317_s8, 16, %s319_s28, [#allocation3 + $0xd] }
  0xd9   :  { %s325_s10 = scalar_select %p324_p9, %s1417_s29, 0 }
  0xda   :  { %p631_p1 = scmp.lt.s32.totalorder %s1417_s29, 31  ;;  %p346_p2 = scmp.gt.s32.totalorder %s1427_s20, 0 }
  0xdb   :  { %p637_p3 = scmp.lt.s32.totalorder %s1427_s20, 31  ;;  %s1182_s25 = smov [#allocation2 + $0xf]  }
  0xdc   :  { %s1507_s10 = smov (!%p631_p1, %s325_s10), 31  ;;  %s362_s26 = sshll.u32 %s1182_s25, 4  ;;  %s363_s26 = int_to_ptr.vmem [resolvable:$true] %s362_s26 }
  0xdd   :  { %s347_s15 = scalar_select %p346_p2, %s1427_s20, 0 }
  0xde   :  { %s328_s24 = scalar_lea.hbm %s1466_s1, %s1507_s10 }
  0xdf   :  { %s338_s18 = sshll.u32 %s328_s24, 4  ;;  %s339_s18 = int_to_ptr.hbm [resolvable:$true] %s338_s18 }
  0xe0   :  { %s1058_s19 = sshra.s32 %s339_s18, 4  ;;  %s1059_s19 = int_to_ptr.hbm [resolvable:$true] %s1058_s19 }
  0xe1   :  { %s1060_s0 = scalar_lea.hbm %s1059_s19, 1  ;;  %p1063_p5 = scmp.lt.s32.totalorder %s1059_s19, %s1466_s1 }
  0xe2   :  { %p1061_p4 = scmp.ne.s32.totalorder %s1059_s19, %s1060_s0  ;;  %p1064_p6 = scmp.lt.s32.totalorder %s1226_s6, %s1060_s0 }
  0xe4   :  { %p1065_p7 = por %p1064_p6, %p1063_p5 }
  0xe6   :  { %p1066_p8 = pnand %p1065_p7, %p1061_p4 }
  0xe8   :  { %1069 = shalt.err (!%p1066_p8)  }
  0xe9   :  { %343 = dma.hbm_to_vmem [thread:$0]  %s339_s18, 16, %s341_s12, [#allocation3 + $0xe] }
  0xea   :  { %s1509_s15 = smov (!%p637_p3, %s347_s15), 31 }
  0xeb   :  { %s350_s3 = scalar_lea.hbm %s1466_s1, %s1509_s15 }
  0xec   :  { %s360_s4 = sshll.u32 %s350_s3, 4  ;;  %s361_s4 = int_to_ptr.hbm [resolvable:$true] %s360_s4 }
  0xed   :  { %s1082_s5 = sshra.s32 %s361_s4, 4  ;;  %s1083_s5 = int_to_ptr.hbm [resolvable:$true] %s1082_s5 }
  0xee   :  { %s1084_s21 = scalar_lea.hbm %s1083_s5, 1  ;;  %p1087_p10 = scmp.lt.s32.totalorder %s1083_s5, %s1466_s1 }
  0xef   :  { %p1085_p9 = scmp.ne.s32.totalorder %s1083_s5, %s1084_s21  ;;  %p1088_p11 = scmp.lt.s32.totalorder %s1226_s6, %s1084_s21 }
  0xf1   :  { %p1089_p13 = por %p1088_p11, %p1087_p10 }
  0xf3   :  { %p1090_p12 = pnand %p1089_p13, %p1085_p9 }
  0xf5   :  { %1093 = shalt.err (!%p1090_p12)  }
  0xf6   :  { %365 = dma.hbm_to_vmem [thread:$0]  %s361_s4, 16, %s363_s26, [#allocation3 + $0xf] }
  0xf7   :  { %1132 = dma.done.wait [#allocation3], 16 }
  0xf8   :  { %1133 = vsyncadd [#allocation3], 4294967280 }
  0xf9   :  { %1134 = dma.done.wait [#allocation3 + $0x1], 16 }
  0xfa   :  { %1135 = vsyncadd [#allocation3 + $0x1], 4294967280 }
  0xfb   :  { %1136 = dma.done.wait [#allocation3 + $0x2], 16 }
  0xfc   :  { %1137 = vsyncadd [#allocation3 + $0x2], 4294967280 }
  0xfd   :  { %1138 = dma.done.wait [#allocation3 + $0x3], 16 }
  0xfe   :  { %1139 = vsyncadd [#allocation3 + $0x3], 4294967280 }
  0xff   :  { %1140 = dma.done.wait [#allocation3 + $0x4], 16 }
 0x100   :  { %1141 = vsyncadd [#allocation3 + $0x4], 4294967280 }
 0x101   :  { %1142 = dma.done.wait [#allocation3 + $0x5], 16 }
 0x102   :  { %1143 = vsyncadd [#allocation3 + $0x5], 4294967280 }
 0x103   :  { %1144 = dma.done.wait [#allocation3 + $0x6], 16 }
 0x104   :  { %1145 = vsyncadd [#allocation3 + $0x6], 4294967280 }
 0x105   :  { %1146 = dma.done.wait [#allocation3 + $0x7], 16 }
 0x106   :  { %1147 = vsyncadd [#allocation3 + $0x7], 4294967280 }
 0x107   :  { %1148 = dma.done.wait [#allocation3 + $0x8], 16 }
 0x108   :  { %1149 = vsyncadd [#allocation3 + $0x8], 4294967280 }
 0x109   :  { %1150 = dma.done.wait [#allocation3 + $0x9], 16 }
 0x10a   :  { %1151 = vsyncadd [#allocation3 + $0x9], 4294967280 }
 0x10b   :  { %1152 = dma.done.wait [#allocation3 + $0xa], 16 }
 0x10c   :  { %1153 = vsyncadd [#allocation3 + $0xa], 4294967280 }
 0x10d   :  { %1154 = dma.done.wait [#allocation3 + $0xb], 16 }
 0x10e   :  { %1155 = vsyncadd [#allocation3 + $0xb], 4294967280 }
 0x10f   :  { %1156 = dma.done.wait [#allocation3 + $0xc], 16 }
 0x110   :  { %1157 = vsyncadd [#allocation3 + $0xc], 4294967280 }
 0x111   :  { %1158 = dma.done.wait [#allocation3 + $0xd], 16 }
 0x112   :  { %1159 = vsyncadd [#allocation3 + $0xd], 4294967280 }
 0x113   :  { %1160 = dma.done.wait [#allocation3 + $0xe], 16 }
 0x114   :  { %1161 = vsyncadd [#allocation3 + $0xe], 4294967280 }
 0x115   :  { %1162 = dma.done.wait [#allocation3 + $0xf], 16 }
 0x116   :  { %1163 = vsyncadd [#allocation3 + $0xf], 4294967280  ;;  %s1183_s1 = smov [#allocation6]   ;;  %s408_s11 = sshll.u32 %s1467_s2, 4  ;;  %v398_v0 = vld [vmem:[#allocation2] sm:$0xff]  ;;  %v399_v1 = vld [vmem:[#allocation2 + $0x8] sm:$0xff]  ;;  %s409_s11 = int_to_ptr.hbm [resolvable:$true] %s408_s11 }
 0x117   :  { %s406_s6 = sshll.u32 %s1183_s1, 4  ;;  %400 = vst [vmem:[#allocation6] sm:$0xff] %v398_v0  ;;  %s1184_s12 = smov 128   ;;  %s407_s6 = int_to_ptr.vmem [resolvable:$true] %s406_s6 }
 0x118   :  { %401 = vst [vmem:[#allocation6 + $0x8] sm:$0xff] %v399_v1  ;;  %s1185_s13 = smov 8  }
 0x119   :  { %414 = dma.vmem_to_hbm [thread:$0]  %s407_s6, 256, %s409_s11, [#allocation7], %s1184_s12, %s1184_s12, %s1185_s13  }
 0x11a   :  { %1164 = dma.done.wait [#allocation7], 256  }
 0x11b   :  { %1165 = vsyncadd [#allocation7], 4294967040 }
 0x11c   :  { %419 = vsyncpa [#allocation7], 1 }
 0x11d   :  { %420 = vsyncmov [#allocation3] }
 0x120   :  { %s421_s14 = vpop.sfrf %420 }
 0x121   :  { %p642_p0 = scmp.ne.s32.totalorder %s421_s14, 0 }
 0x123   :  { %425 = shalt.err (%p642_p0)  }
 0x124   :  { %427 = vsyncmov [#allocation3 + $0x1] }
 0x127   :  { %s428_s9 = vpop.sfrf %427 }
 0x128   :  { %p643_p1 = scmp.ne.s32.totalorder %s428_s9, 0 }
 0x12a   :  { %432 = shalt.err (%p643_p1)  }
 0x12b   :  { %434 = vsyncmov [#allocation3 + $0x2] }
 0x12e   :  { %s435_s2 = vpop.sfrf %434 }
 0x12f   :  { %p644_p2 = scmp.ne.s32.totalorder %s435_s2, 0 }
 0x131   :  { %439 = shalt.err (%p644_p2)  }
 0x132   :  { %441 = vsyncmov [#allocation3 + $0x3] }
 0x135   :  { %s442_s7 = vpop.sfrf %441 }
 0x136   :  { %p645_p3 = scmp.ne.s32.totalorder %s442_s7, 0 }
 0x138   :  { %446 = shalt.err (%p645_p3)  }
 0x139   :  { %448 = vsyncmov [#allocation3 + $0x4] }
 0x13c   :  { %s449_s10 = vpop.sfrf %448 }
 0x13d   :  { %p646_p4 = scmp.ne.s32.totalorder %s449_s10, 0 }
 0x13f   :  { %453 = shalt.err (%p646_p4)  }
 0x140   :  { %455 = vsyncmov [#allocation3 + $0x5] }
 0x143   :  { %s456_s15 = vpop.sfrf %455 }
 0x144   :  { %p647_p5 = scmp.ne.s32.totalorder %s456_s15, 0 }
 0x146   :  { %460 = shalt.err (%p647_p5)  }
 0x147   :  { %462 = vsyncmov [#allocation3 + $0x6] }
 0x14a   :  { %s463_s17 = vpop.sfrf %462 }
 0x14b   :  { %p648_p6 = scmp.ne.s32.totalorder %s463_s17, 0 }
 0x14d   :  { %467 = shalt.err (%p648_p6)  }
 0x14e   :  { %469 = vsyncmov [#allocation3 + $0x7] }
 0x151   :  { %s470_s23 = vpop.sfrf %469 }
 0x152   :  { %p649_p7 = scmp.ne.s32.totalorder %s470_s23, 0 }
 0x154   :  { %474 = shalt.err (%p649_p7)  }
 0x155   :  { %476 = vsyncmov [#allocation3 + $0x8] }
 0x158   :  { %s477_s24 = vpop.sfrf %476 }
 0x159   :  { %p650_p8 = scmp.ne.s32.totalorder %s477_s24, 0 }
 0x15b   :  { %481 = shalt.err (%p650_p8)  }
 0x15c   :  { %483 = vsyncmov [#allocation3 + $0x9] }
 0x15f   :  { %s484_s18 = vpop.sfrf %483 }
 0x160   :  { %p651_p9 = scmp.ne.s32.totalorder %s484_s18, 0 }
 0x162   :  { %488 = shalt.err (%p651_p9)  }
 0x163   :  { %490 = vsyncmov [#allocation3 + $0xa] }
 0x166   :  { %s491_s25 = vpop.sfrf %490 }
 0x167   :  { %p652_p10 = scmp.ne.s32.totalorder %s491_s25, 0 }
 0x169   :  { %495 = shalt.err (%p652_p10)  }
 0x16a   :  { %497 = vsyncmov [#allocation3 + $0xb] }
 0x16d   :  { %s498_s26 = vpop.sfrf %497 }
 0x16e   :  { %p653_p11 = scmp.ne.s32.totalorder %s498_s26, 0 }
 0x170   :  { %502 = shalt.err (%p653_p11)  }
 0x171   :  { %504 = vsyncmov [#allocation3 + $0xc] }
 0x174   :  { %s505_s19 = vpop.sfrf %504 }
 0x175   :  { %p654_p13 = scmp.ne.s32.totalorder %s505_s19, 0 }
 0x177   :  { %509 = shalt.err (%p654_p13)  }
 0x178   :  { %511 = vsyncmov [#allocation3 + $0xd] }
 0x17b   :  { %s512_s0 = vpop.sfrf %511 }
 0x17c   :  { %p655_p12 = scmp.ne.s32.totalorder %s512_s0, 0 }
 0x17e   :  { %516 = shalt.err (%p655_p12)  }
 0x17f   :  { %518 = vsyncmov [#allocation3 + $0xe] }
 0x182   :  { %s519_s22 = vpop.sfrf %518 }
 0x183   :  { %p656_p0 = scmp.ne.s32.totalorder %s519_s22, 0 }
 0x185   :  { %523 = shalt.err (%p656_p0)  }
 0x186   :  { %525 = vsyncmov [#allocation3 + $0xf] }
 0x189   :  { %s526_s28 = vpop.sfrf %525 }
 0x18a   :  { %p657_p1 = scmp.ne.s32.totalorder %s526_s28, 0 }
 0x18c   :  { %530 = shalt.err (%p657_p1)  }

</bundles_post_ra>
